<compile_context>
chip_gen: v7x
topology: tpu7x:2x2x1
jax: 0.10.0
libtpu: 0.0.40
codegen_flags: <defaults>
</compile_context>

<pallas_src>
import functools
import math

import jax
import jax.numpy as jnp
from jax import lax
from jax.experimental import pallas as pl
from jax.experimental.pallas import tpu as pltpu


def _fused_mhla_gn_kernel(x_ref, wqkv_ref, wo_ref, bias_ref, mask_ref, gamma_ref, beta_ref,
                          o_ref,
                          m_ref, l_ref, acc_ref, proj_ref, qcache_ref, ybuf_ref,
                          s1_ref, s2_ref,
                          *, num_heads, head_dim, scale, inv_count, eps):
    """Fused linear attention + GroupNorm(1, C).  grid = (B, 3, NT).

    phase 0 (per spatial tile): one (3*hidden, C)@(C, TN) QKV matmul; softmax(Q) over
      head_dim is cached in VMEM; K runs an online softmax over the spatial axis and the
      context acc[i, e] = sum_n exp(K[i,n]-m[i]) * V[e,n] is accumulated for ALL heads at
      once as a single (hidden, hidden) matrix (cross-head blocks are garbage and masked
      out at finalize).  At the last tile the normalized, scaled context is folded into
      the output projection: proj = Wout @ (scale * acc / l * head_mask)^T  -> (C, hidden).
    phase 1 (per tile): y = proj @ softmax(Q) + bias, stored into a VMEM-resident slab;
      GroupNorm sum / sum-of-squares accumulated in f32.
    phase 2 (per tile): normalize the resident slab, apply gamma/beta, write output tile.

    NOTE on out_specs: the output block index is pinned to 0 during phases 0/1 and only
    tracks t in phase 2, so every block-index change (= HBM writeback) happens strictly
    after that block was written with correct data in phase 2.
    """
    p = pl.program_id(1)
    t = pl.program_id(2)
    nt = pl.num_programs(2)
    hidden = num_heads * head_dim

    @pl.when(jnp.logical_and(p == 0, t == 0))
    def _init():
        m_ref[...] = jnp.full_like(m_ref, -jnp.inf)
        l_ref[...] = jnp.zeros_like(l_ref)
        acc_ref[...] = jnp.zeros_like(acc_ref)
        s1_ref[...] = jnp.zeros_like(s1_ref)
        s2_ref[...] = jnp.zeros_like(s2_ref)

    @pl.when(p == 0)
    def _build_context_and_cache_q():
        x = x_ref[0].astype(jnp.bfloat16)                          # (C, TN)
        tn = x.shape[-1]
        # Single batched QKV projection (all heads): (3*hidden, C) @ (C, TN), f32 accum.
        qkv = jnp.dot(wqkv_ref[...], x, preferred_element_type=jnp.float32)
        q_all = qkv[:hidden]                                       # (hidden, TN)
        k_all = qkv[hidden:2 * hidden]
        v_all = qkv[2 * hidden:]

        # softmax(Q) over head_dim, all heads batched via a sublane-split reshape.
        q3 = q_all.reshape(num_heads, head_dim, tn)
        q3 = q3 - jnp.max(q3, axis=1, keepdims=True)
        eq = jnp.exp(q3)
        qs = eq * pl.reciprocal(jnp.sum(eq, axis=1, keepdims=True), approx=True)
        qcache_ref[t] = qs.reshape(hidden, tn).astype(qcache_ref.dtype)

        # Online softmax over the spatial axis for K + batched context accumulation.
        m_old = m_ref[...]                                         # (hidden, 1)
        m_new = jnp.maximum(m_old, jnp.max(k_all, axis=-1, keepdims=True))
        alpha = jnp.exp(m_old - m_new)
        pk = jnp.exp(k_all - m_new)                                # (hidden, TN), f32
        l_ref[...] = l_ref[...] * alpha + jnp.sum(pk, axis=-1, keepdims=True)
        # acc[i, e] += sum_n pk[i, n] * v[e, n]   (contract the lane axis)
        acc_ref[...] = acc_ref[...] * alpha + lax.dot_general(
            pk.astype(jnp.bfloat16), v_all.astype(jnp.bfloat16),
            (((1,), (1,)), ((), ())), preferred_element_type=jnp.float32)
        m_ref[...] = m_new

        @pl.when(t == nt - 1)
        def _finalize_projection():
            inv_l = pl.reciprocal(l_ref[...], approx=True)         # (hidden, 1)
            # Normalize, scale, and keep only per-head (block-diagonal) context terms.
            ctxt = acc_ref[...] * inv_l * scale * mask_ref[...]    # (hidden, hidden)
            # proj[c, i] = sum_e Wout[c, e] * ctxt[i, e]  -> (C, hidden)
            proj_ref[...] = lax.dot_general(
                wo_ref[...], ctxt.astype(jnp.bfloat16),
                (((1,), (1,)), ((), ())),
                preferred_element_type=jnp.float32).astype(proj_ref.dtype)

    @pl.when(p == 1)
    def _emit_y_and_stats():
        yt = jnp.dot(proj_ref[...], qcache_ref[t],
                     preferred_element_type=jnp.float32)           # (C, TN)
        yt = yt + bias_ref[...]
        ybuf_ref[t] = yt                                           # resident, never to HBM
        # GroupNorm(1, C) statistics in f32.  (E[x^2]-E[x]^2; fine at these magnitudes.)
        s1_ref[...] += jnp.sum(yt, keepdims=True)
        s2_ref[...] += jnp.sum(yt * yt, keepdims=True)

    @pl.when(p == 2)
    def _groupnorm_and_store():
        mean = s1_ref[...] * inv_count                             # (1, 1)
        var = s2_ref[...] * inv_count - mean * mean
        rstd = lax.rsqrt(var + eps)
        yt = ybuf_ref[t]
        o_ref[0] = ((yt - mean) * rstd * gamma_ref[...] + beta_ref[...]).astype(o_ref.dtype)


def _pick_spatial_tile(n):
    """Largest lane-dense spatial tile.  The per-batch resident scratches (softmax(Q)
    cache, pre-GN slab) are O(N) regardless of the tile, so the tile only sizes the
    double-buffered x / out blocks -> take the whole spatial extent when reasonable."""
    if n <= 8192:
        return n
    for cand in (8192, 4096, 2048, 1024, 512, 256, 128):
        if n % cand == 0:
            return cand
    return n  # TODO(synk): N not a multiple of 128 would need masked edge tiles.


def mhla2d_forward(x_nchw, w_qkv, w_out, b_out, gn_weight, gn_bias,
                   *, num_heads, head_dim, eps=1e-5):
    """MultiHeadLinearAttn2D.forward == GroupNorm(1, C)(CalcLinearAtt(x)).

    x_nchw: (B, C, H, W); w_qkv: (3*hidden, C) [no bias]; w_out: (C, hidden); b_out: (C,);
    gn_weight, gn_bias: (C,) GroupNorm affine parameters.
    """
    B, C, H, W = x_nchw.shape
    N = H * W
    hidden = num_heads * head_dim
    scale = 1.0 / math.sqrt(head_dim)

    TN = _pick_spatial_tile(N)
    NT = N // TN

    # Channels-first, flattened spatial: N sits on the 128-lane axis (free reshapes only).
    x = x_nchw.reshape(B, C, N)                             # keep f32; cast in-kernel
    wqkv = w_qkv.astype(jnp.bfloat16)                       # (3*hidden, C)
    wo = w_out.astype(jnp.bfloat16)                         # (C, hidden)
    bias = b_out.reshape(C, 1).astype(jnp.float32)
    gamma = gn_weight.reshape(C, 1).astype(jnp.float32)
    beta = gn_bias.reshape(C, 1).astype(jnp.float32)
    # Block-diagonal head mask: discards cross-head terms of the batched context matrix.
    hd = jnp.arange(hidden) // head_dim
    head_mask = (hd[:, None] == hd[None, :]).astype(jnp.float32)

    kernel = functools.partial(
        _fused_mhla_gn_kernel, num_heads=num_heads, head_dim=head_dim,
        scale=scale, inv_count=1.0 / float(C * N), eps=float(eps))

    # TODO(synk): for very large C*N (resident softmax(Q)+y slab beyond ~16 MiB of VMEM)
    # fall back to a two-kernel variant with a bf16 HBM intermediate instead of the slab.
    out = pl.pallas_call(
        kernel,
        out_shape=jax.ShapeDtypeStruct((B, C, N), x_nchw.dtype),
        grid=(B, 3, NT),
        in_specs=[
            # x is only consumed in phase 0: pin its block afterwards so it is fetched
            # from HBM exactly once per batch.
            pl.BlockSpec((1, C, TN), lambda b, p, t: (b, 0, jnp.where(p == 0, t, NT - 1))),
            pl.BlockSpec((3 * hidden, C), lambda b, p, t: (0, 0)),
            pl.BlockSpec((C, hidden), lambda b, p, t: (0, 0)),
            pl.BlockSpec((C, 1), lambda b, p, t: (0, 0)),
            pl.BlockSpec((hidden, hidden), lambda b, p, t: (0, 0)),
            pl.BlockSpec((C, 1), lambda b, p, t: (0, 0)),
            pl.BlockSpec((C, 1), lambda b, p, t: (0, 0)),
        ],
        # Output blocks are written only in phase 2; pinned to block 0 before that so
        # every HBM writeback is preceded by a correct phase-2 write of that block.
        out_specs=pl.BlockSpec((1, C, TN), lambda b, p, t: (b, 0, jnp.where(p == 2, t, 0))),
        scratch_shapes=[
            pltpu.VMEM((hidden, 1), jnp.float32),            # running max (K online softmax)
            pltpu.VMEM((hidden, 1), jnp.float32),            # running denom l
            pltpu.VMEM((hidden, hidden), jnp.float32),       # context accumulator (all heads)
            pltpu.VMEM((C, hidden), jnp.bfloat16),           # Wout folded with the context
            pltpu.VMEM((NT, hidden, TN), jnp.bfloat16),      # cached softmax(Q), whole batch
            pltpu.VMEM((NT, C, TN), jnp.float32),            # resident pre-GN output slab
            pltpu.VMEM((1, 1), jnp.float32),                 # GroupNorm sum
            pltpu.VMEM((1, 1), jnp.float32),                 # GroupNorm sum of squares
        ],
        compiler_params=pltpu.CompilerParams(
            dimension_semantics=("parallel", "arbitrary", "arbitrary")),
    )(x, wqkv, wo, bias, head_mask, gamma, beta)

    return out.reshape(B, C, H, W)


def _reference(x_nchw, w_qkv, w_out, b_out, gn_weight, gn_bias,
               *, num_heads, head_dim, eps=1e-5):
    """Pure-JAX (f32) re-implementation of MultiHeadLinearAttn2D.forward for verification."""
    B, C, H, W = x_nchw.shape
    N = H * W
    hidden = num_heads * head_dim
    scale = 1.0 / math.sqrt(head_dim)
    xf = x_nchw.reshape(B, C, N)
    qkv = jnp.einsum('oc,bcn->bon', w_qkv, xf).reshape(B, 3, num_heads, head_dim, N)
    q, k, v = qkv[:, 0], qkv[:, 1], qkv[:, 2]                 # (B, h, d, N)
    q = jax.nn.softmax(q, axis=-2)                            # softmax over head_dim
    k = jax.nn.softmax(k, axis=-1)                            # softmax over N
    ctxt = jnp.einsum('bhij,bhdj->bhid', k, v)                # (B, h, d_k, d_v)
    att = jnp.einsum('bhdi,bhdj->bhij', ctxt, q) * scale      # (B, h, d_v, N)
    o = att.reshape(B, hidden, N)                             # b (h d) n
    y = jnp.einsum('oc,bcn->bon', w_out, o) + b_out[None, :, None]
    mu = jnp.mean(y.reshape(B, -1), axis=1)[:, None, None]
    var = jnp.var(y.reshape(B, -1), axis=1)[:, None, None]
    yn = (y - mu) / jnp.sqrt(var + eps)
    yn = yn * gn_weight[None, :, None] + gn_bias[None, :, None]
    return yn.reshape(B, C, H, W)


if __name__ == "__main__":
    # Module config
    in_channel = 4
    num_heads = 4
    head_dim = 8
    hidden = num_heads * head_dim                 # 32

    # Input (B, C, H, W); H = W = 16 -> N = 256 (one full-width lane-dense tile).
    B, H, W = 2, 16, 16
    key = jax.random.PRNGKey(0)
    kx, kq, ko, kb, kg, kbeta = jax.random.split(key, 6)
    x = jax.random.normal(kx, (B, in_channel, H, W), dtype=jnp.float32)

    # 1x1-conv weights collapsed to 2-D matrices; GroupNorm affine params near (1, 0).
    w_qkv = jax.random.normal(kq, (3 * hidden, in_channel), dtype=jnp.float32) * 0.1
    w_out = jax.random.normal(ko, (in_channel, hidden), dtype=jnp.float32) * 0.1
    b_out = jax.random.normal(kb, (in_channel,), dtype=jnp.float32) * 0.1
    gn_w = 1.0 + 0.1 * jax.random.normal(kg, (in_channel,), dtype=jnp.float32)
    gn_b = 0.1 * jax.random.normal(kbeta, (in_channel,), dtype=jnp.float32)

    y = mhla2d_forward(x, w_qkv, w_out, b_out, gn_w, gn_b,
                       num_heads=num_heads, head_dim=head_dim)
    y = jax.block_until_ready(y)

    y_ref = _reference(x, w_qkv, w_out, b_out, gn_w, gn_b,
                       num_heads=num_heads, head_dim=head_dim)
    assert y.shape == (B, in_channel, H, W)
    # bf16 MXU operands -> compare against the f32 reference with a bf16-appropriate tolerance.
    assert jnp.allclose(y, y_ref, atol=3e-2, rtol=3e-2), (
        "mismatch vs reference: max abs err = %e"
        % float(jnp.max(jnp.abs(y - y_ref))))
    print("KERNEL_OK")
</pallas_src>

<mosaic_0001>
module attributes {stable_mosaic.version = 11 : i64} {
  func.func @_fused_mhla_gn_kernel(%arg0: i32, %arg1: i32, %arg2: i32, %arg3: memref<1x4x256xf32, #tpu.memory_space<vmem>>, %arg4: memref<96x4xbf16, #tpu.memory_space<vmem>>, %arg5: memref<4x32xbf16, #tpu.memory_space<vmem>>, %arg6: memref<4x1xf32, #tpu.memory_space<vmem>>, %arg7: memref<32x32xf32, #tpu.memory_space<vmem>>, %arg8: memref<4x1xf32, #tpu.memory_space<vmem>>, %arg9: memref<4x1xf32, #tpu.memory_space<vmem>>, %arg10: memref<1x4x256xf32, #tpu.memory_space<vmem>>, %arg11: memref<32x1xf32, #tpu.memory_space<vmem>>, %arg12: memref<32x1xf32, #tpu.memory_space<vmem>>, %arg13: memref<32x32xf32, #tpu.memory_space<vmem>>, %arg14: memref<4x32xbf16, #tpu.memory_space<vmem>>, %arg15: memref<1x32x256xbf16, #tpu.memory_space<vmem>>, %arg16: memref<1x4x256xf32, #tpu.memory_space<vmem>>, %arg17: memref<1x1xf32, #tpu.memory_space<vmem>>, %arg18: memref<1x1xf32, #tpu.memory_space<vmem>>) attributes {dimension_semantics = [#tpu.dimension_semantics<parallel>, #tpu.dimension_semantics<arbitrary>, #tpu.dimension_semantics<arbitrary>], iteration_bounds = array<i64: 2, 3, 1>, scalar_prefetch = 0 : i64, scratch_operands = 8 : i64, tpu.core_type = #tpu.core_type<tc>, window_params = [{transform_indices = @transform_0, window_bounds = array<i64: 1, 4, 256>}, {pipeline_mode = #tpu.pipeline_mode<synchronous>, transform_indices = @transform_1, window_bounds = array<i64: 96, 4>}, {pipeline_mode = #tpu.pipeline_mode<synchronous>, transform_indices = @transform_2, window_bounds = array<i64: 4, 32>}, {pipeline_mode = #tpu.pipeline_mode<synchronous>, transform_indices = @transform_3, window_bounds = array<i64: 4, 1>}, {pipeline_mode = #tpu.pipeline_mode<synchronous>, transform_indices = @transform_4, window_bounds = array<i64: 32, 32>}, {pipeline_mode = #tpu.pipeline_mode<synchronous>, transform_indices = @transform_5, window_bounds = array<i64: 4, 1>}, {pipeline_mode = #tpu.pipeline_mode<synchronous>, transform_indices = @transform_6, window_bounds = array<i64: 4, 1>}, {transform_indices = @transform_7, window_bounds = array<i64: 1, 4, 256>}]} {
    %c0_i32 = arith.constant 0 : i32
    %0 = arith.cmpi eq, %arg1, %c0_i32 : i32
    %c0_i32_0 = arith.constant 0 : i32
    %1 = arith.cmpi eq, %arg2, %c0_i32_0 : i32
    %2 = arith.andi %0, %1 : i1
    %3 = arith.extui %2 : i1 to i32
    %c0_i32_1 = arith.constant 0 : i32
    %4 = arith.cmpi ne, %3, %c0_i32_1 : i32
    scf.if %4 {
      %cst = arith.constant 0xFF800000 : f32
      %14 = vector.broadcast %cst : f32 to vector<32x1xf32>
      %c0 = arith.constant 0 : index
      %c0_6 = arith.constant 0 : index
      %15 = vector.load %arg11[%c0, %c0_6] : memref<32x1xf32, #tpu.memory_space<vmem>>, vector<32x1xf32>
      tpu.vector_store %arg11[%c0, %c0_6], %14 {strides = array<i32>} : memref<32x1xf32, #tpu.memory_space<vmem>>, vector<32x1xf32>,
      %cst_7 = arith.constant 0.000000e+00 : f32
      %16 = vector.broadcast %cst_7 : f32 to vector<32x1xf32>
      %c0_8 = arith.constant 0 : index
      %c0_9 = arith.constant 0 : index
      %17 = vector.load %arg12[%c0_8, %c0_9] : memref<32x1xf32, #tpu.memory_space<vmem>>, vector<32x1xf32>
      tpu.vector_store %arg12[%c0_8, %c0_9], %16 {strides = array<i32>} : memref<32x1xf32, #tpu.memory_space<vmem>>, vector<32x1xf32>,
      %cst_10 = arith.constant 0.000000e+00 : f32
      %18 = vector.broadcast %cst_10 : f32 to vector<32x32xf32>
      %c0_11 = arith.constant 0 : index
      %c0_12 = arith.constant 0 : index
      %19 = vector.load %arg13[%c0_11, %c0_12] : memref<32x32xf32, #tpu.memory_space<vmem>>, vector<32x32xf32>
      tpu.vector_store %arg13[%c0_11, %c0_12], %18 {strides = array<i32>} : memref<32x32xf32, #tpu.memory_space<vmem>>, vector<32x32xf32>,
      %cst_13 = arith.constant 0.000000e+00 : f32
      %20 = vector.broadcast %cst_13 : f32 to vector<1x1xf32>
      %c0_14 = arith.constant 0 : index
      %c0_15 = arith.constant 0 : index
      %21 = vector.load %arg17[%c0_14, %c0_15] : memref<1x1xf32, #tpu.memory_space<vmem>>, vector<1x1xf32>
      tpu.vector_store %arg17[%c0_14, %c0_15], %20 {strides = array<i32>} : memref<1x1xf32, #tpu.memory_space<vmem>>, vector<1x1xf32>,
      %cst_16 = arith.constant 0.000000e+00 : f32
      %22 = vector.broadcast %cst_16 : f32 to vector<1x1xf32>
      %c0_17 = arith.constant 0 : index
      %c0_18 = arith.constant 0 : index
      %23 = vector.load %arg18[%c0_17, %c0_18] : memref<1x1xf32, #tpu.memory_space<vmem>>, vector<1x1xf32>
      tpu.vector_store %arg18[%c0_17, %c0_18], %22 {strides = array<i32>} : memref<1x1xf32, #tpu.memory_space<vmem>>, vector<1x1xf32>,
    } else {
    }
    %c0_i32_2 = arith.constant 0 : i32
    %5 = arith.cmpi eq, %arg1, %c0_i32_2 : i32
    %6 = arith.extui %5 : i1 to i32
    %c0_i32_3 = arith.constant 0 : i32
    %7 = arith.cmpi ne, %6, %c0_i32_3 : i32
    scf.if %7 {
      %c0 = arith.constant 0 : index
      %c0_6 = arith.constant 0 : index
      %c0_7 = arith.constant 0 : index
      %14 = vector.load %arg3[%c0, %c0_6, %c0_7] : memref<1x4x256xf32, #tpu.memory_space<vmem>>, vector<1x4x256xf32>
      %15 = vector.shape_cast %14 : vector<1x4x256xf32> to vector<4x256xf32>
      %16 = arith.truncf %15 : vector<4x256xf32> to vector<4x256xbf16>
      %c0_8 = arith.constant 0 : index
      %c0_9 = arith.constant 0 : index
      %17 = vector.load %arg4[%c0_8, %c0_9] : memref<96x4xbf16, #tpu.memory_space<vmem>>, vector<96x4xbf16>
      %cst = arith.constant dense<0.000000e+00> : vector<96x256xf32>
      %18 = tpu.matmul %17, %16, %cst {dimension_numbers = #tpu.dot_dimension_numbers<[1], [0], [0], [1], [0, 0, 1, 1], [], []>} : vector<96x4xbf16>, vector<4x256xbf16>, vector<96x256xf32> -> vector<96x256xf32>
      %19 = vector.extract_strided_slice %18 {offsets = [0, 0], sizes = [32, 256], strides = [1, 1]} : vector<96x256xf32> to vector<32x256xf32>
      %20 = vector.extract_strided_slice %18 {offsets = [32, 0], sizes = [32, 256], strides = [1, 1]} : vector<96x256xf32> to vector<32x256xf32>
      %21 = vector.extract_strided_slice %18 {offsets = [64, 0], sizes = [32, 256], strides = [1, 1]} : vector<96x256xf32> to vector<32x256xf32>
      %22 = vector.shape_cast %19 : vector<32x256xf32> to vector<4x8x256xf32>
      %cst_10 = arith.constant dense<0xFF800000> : vector<4x256xf32>
      %23 = vector.multi_reduction <maximumf>, %22, %cst_10 [1] : vector<4x8x256xf32> to vector<4x256xf32>
      %24 = vector.shape_cast %23 : vector<4x256xf32> to vector<4x1x256xf32>
      %25 = vector.broadcast %24 : vector<4x1x256xf32> to vector<4x8x256xf32>
      %26 = arith.subf %22, %25 : vector<4x8x256xf32>
      %27 = math.exp %26 : vector<4x8x256xf32>
      %cst_11 = arith.constant dense<0.000000e+00> : vector<4x256xf32>
      %28 = vector.multi_reduction <add>, %27, %cst_11 [1] : vector<4x8x256xf32> to vector<4x256xf32>
      %29 = vector.shape_cast %28 : vector<4x256xf32> to vector<4x1x256xf32>
      %30 = tpu.reciprocal %29 {approx = true} : vector<4x1x256xf32> -> vector<4x1x256xf32>
      %31 = vector.broadcast %30 : vector<4x1x256xf32> to vector<4x8x256xf32>
      %32 = arith.mulf %27, %31 : vector<4x8x256xf32>
      %33 = vector.shape_cast %32 : vector<4x8x256xf32> to vector<32x256xf32>
      %34 = arith.truncf %33 : vector<32x256xf32> to vector<32x256xbf16>
      %35 = arith.index_cast %arg2 : i32 to index
      %c0_12 = arith.constant 0 : index
      %c0_13 = arith.constant 0 : index
      %36 = vector.load %arg15[%35, %c0_12, %c0_13] : memref<1x32x256xbf16, #tpu.memory_space<vmem>>, vector<1x32x256xbf16>
      %37 = vector.shape_cast %36 : vector<1x32x256xbf16> to vector<32x256xbf16>
      %38 = vector.shape_cast %34 : vector<32x256xbf16> to vector<1x32x256xbf16>
      tpu.vector_store %arg15[%35, %c0_12, %c0_13], %38 {strides = array<i32>} : memref<1x32x256xbf16, #tpu.memory_space<vmem>>, vector<1x32x256xbf16>,
      %c0_14 = arith.constant 0 : index
      %c0_15 = arith.constant 0 : index
      %39 = vector.load %arg11[%c0_14, %c0_15] : memref<32x1xf32, #tpu.memory_space<vmem>>, vector<32x1xf32>
      %cst_16 = arith.constant dense<0xFF800000> : vector<32xf32>
      %40 = vector.multi_reduction <maximumf>, %20, %cst_16 [1] : vector<32x256xf32> to vector<32xf32>
      %41 = vector.shape_cast %40 : vector<32xf32> to vector<32x1xf32>
      %42 = arith.maximumf %39, %41 : vector<32x1xf32>
      %43 = arith.subf %39, %42 : vector<32x1xf32>
      %44 = math.exp %43 : vector<32x1xf32>
      %45 = vector.broadcast %42 : vector<32x1xf32> to vector<32x256xf32>
      %46 = arith.subf %20, %45 : vector<32x256xf32>
      %47 = math.exp %46 : vector<32x256xf32>
      %c0_17 = arith.constant 0 : index
      %c0_18 = arith.constant 0 : index
      %48 = vector.load %arg12[%c0_17, %c0_18] : memref<32x1xf32, #tpu.memory_space<vmem>>, vector<32x1xf32>
      %49 = arith.mulf %48, %44 : vector<32x1xf32>
      %cst_19 = arith.constant dense<0.000000e+00> : vector<32xf32>
      %50 = vector.multi_reduction <add>, %47, %cst_19 [1] : vector<32x256xf32> to vector<32xf32>
      %51 = vector.shape_cast %50 : vector<32xf32> to vector<32x1xf32>
      %52 = arith.addf %49, %51 : vector<32x1xf32>
      %c0_20 = arith.constant 0 : index
      %c0_21 = arith.constant 0 : index
      %53 = vector.load %arg12[%c0_20, %c0_21] : memref<32x1xf32, #tpu.memory_space<vmem>>, vector<32x1xf32>
      tpu.vector_store %arg12[%c0_20, %c0_21], %52 {strides = array<i32>} : memref<32x1xf32, #tpu.memory_space<vmem>>, vector<32x1xf32>,
      %c0_22 = arith.constant 0 : index
      %c0_23 = arith.constant 0 : index
      %54 = vector.load %arg13[%c0_22, %c0_23] : memref<32x32xf32, #tpu.memory_space<vmem>>, vector<32x32xf32>
      %55 = vector.broadcast %44 : vector<32x1xf32> to vector<32x32xf32>
      %56 = arith.mulf %54, %55 : vector<32x32xf32>
      %57 = arith.truncf %47 : vector<32x256xf32> to vector<32x256xbf16>
      %58 = arith.truncf %21 : vector<32x256xf32> to vector<32x256xbf16>
      %cst_24 = arith.constant dense<0.000000e+00> : vector<32x32xf32>
      %59 = tpu.matmul %57, %58, %cst_24 {dimension_numbers = #tpu.dot_dimension_numbers<[1], [1], [0], [0], [0, 0, 1, 0], [], []>} : vector<32x256xbf16>, vector<32x256xbf16>, vector<32x32xf32> -> vector<32x32xf32>
      %60 = arith.addf %56, %59 : vector<32x32xf32>
      %c0_25 = arith.constant 0 : index
      %c0_26 = arith.constant 0 : index
      %61 = vector.load %arg13[%c0_25, %c0_26] : memref<32x32xf32, #tpu.memory_space<vmem>>, vector<32x32xf32>
      tpu.vector_store %arg13[%c0_25, %c0_26], %60 {strides = array<i32>} : memref<32x32xf32, #tpu.memory_space<vmem>>, vector<32x32xf32>,
      %c0_27 = arith.constant 0 : index
      %c0_28 = arith.constant 0 : index
      %62 = vector.load %arg11[%c0_27, %c0_28] : memref<32x1xf32, #tpu.memory_space<vmem>>, vector<32x1xf32>
      tpu.vector_store %arg11[%c0_27, %c0_28], %42 {strides = array<i32>} : memref<32x1xf32, #tpu.memory_space<vmem>>, vector<32x1xf32>,
      %c0_i32_29 = arith.constant 0 : i32
      %63 = arith.cmpi eq, %arg2, %c0_i32_29 : i32
      %64 = arith.extui %63 : i1 to i32
      %c0_i32_30 = arith.constant 0 : i32
      %65 = arith.cmpi ne, %64, %c0_i32_30 : i32
      scf.if %65 {
        %c0_31 = arith.constant 0 : index
        %c0_32 = arith.constant 0 : index
        %66 = vector.load %arg12[%c0_31, %c0_32] : memref<32x1xf32, #tpu.memory_space<vmem>>, vector<32x1xf32>
        %67 = tpu.reciprocal %66 {approx = true} : vector<32x1xf32> -> vector<32x1xf32>
        %c0_33 = arith.constant 0 : index
        %c0_34 = arith.constant 0 : index
        %68 = vector.load %arg13[%c0_33, %c0_34] : memref<32x32xf32, #tpu.memory_space<vmem>>, vector<32x32xf32>
        %69 = vector.broadcast %67 : vector<32x1xf32> to vector<32x32xf32>
        %70 = arith.mulf %68, %69 : vector<32x32xf32>
        %cst_35 = arith.constant 0.353553385 : f32
        %71 = vector.broadcast %cst_35 : f32 to vector<32x32xf32>
        %72 = arith.mulf %70, %71 : vector<32x32xf32>
        %c0_36 = arith.constant 0 : index
        %c0_37 = arith.constant 0 : index
        %73 = vector.load %arg7[%c0_36, %c0_37] : memref<32x32xf32, #tpu.memory_space<vmem>>, vector<32x32xf32>
        %74 = arith.mulf %72, %73 : vector<32x32xf32>
        %c0_38 = arith.constant 0 : index
        %c0_39 = arith.constant 0 : index
        %75 = vector.load %arg5[%c0_38, %c0_39] : memref<4x32xbf16, #tpu.memory_space<vmem>>, vector<4x32xbf16>
        %76 = arith.truncf %74 : vector<32x32xf32> to vector<32x32xbf16>
        %cst_40 = arith.constant dense<0.000000e+00> : vector<4x32xf32>
        %77 = tpu.matmul %75, %76, %cst_40 {dimension_numbers = #tpu.dot_dimension_numbers<[1], [1], [0], [0], [0, 0, 1, 0], [], []>} : vector<4x32xbf16>, vector<32x32xbf16>, vector<4x32xf32> -> vector<4x32xf32>
        %78 = arith.truncf %77 : vector<4x32xf32> to vector<4x32xbf16>
        %c0_41 = arith.constant 0 : index
        %c0_42 = arith.constant 0 : index
        %79 = vector.load %arg14[%c0_41, %c0_42] : memref<4x32xbf16, #tpu.memory_space<vmem>>, vector<4x32xbf16>
        tpu.vector_store %arg14[%c0_41, %c0_42], %78 {strides = array<i32>} : memref<4x32xbf16, #tpu.memory_space<vmem>>, vector<4x32xbf16>,
      } else {
      }
    } else {
    }
    %c1_i32 = arith.constant 1 : i32
    %8 = arith.cmpi eq, %arg1, %c1_i32 : i32
    %9 = arith.extui %8 : i1 to i32
    %c0_i32_4 = arith.constant 0 : i32
    %10 = arith.cmpi ne, %9, %c0_i32_4 : i32
    scf.if %10 {
      %c0 = arith.constant 0 : index
      %c0_6 = arith.constant 0 : index
      %14 = vector.load %arg14[%c0, %c0_6] : memref<4x32xbf16, #tpu.memory_space<vmem>>, vector<4x32xbf16>
      %15 = arith.index_cast %arg2 : i32 to index
      %c0_7 = arith.constant 0 : index
      %c0_8 = arith.constant 0 : index
      %16 = vector.load %arg15[%15, %c0_7, %c0_8] : memref<1x32x256xbf16, #tpu.memory_space<vmem>>, vector<1x32x256xbf16>
      %17 = vector.shape_cast %16 : vector<1x32x256xbf16> to vector<32x256xbf16>
      %cst = arith.constant dense<0.000000e+00> : vector<4x256xf32>
      %18 = tpu.matmul %14, %17, %cst {dimension_numbers = #tpu.dot_dimension_numbers<[1], [0], [0], [1], [0, 0, 1, 1], [], []>} : vector<4x32xbf16>, vector<32x256xbf16>, vector<4x256xf32> -> vector<4x256xf32>
      %c0_9 = arith.constant 0 : index
      %c0_10 = arith.constant 0 : index
      %19 = vector.load %arg6[%c0_9, %c0_10] : memref<4x1xf32, #tpu.memory_space<vmem>>, vector<4x1xf32>
      %20 = vector.broadcast %19 : vector<4x1xf32> to vector<4x256xf32>
      %21 = arith.addf %18, %20 : vector<4x256xf32>
      %22 = arith.index_cast %arg2 : i32 to index
      %c0_11 = arith.constant 0 : index
      %c0_12 = arith.constant 0 : index
      %23 = vector.load %arg16[%22, %c0_11, %c0_12] : memref<1x4x256xf32, #tpu.memory_space<vmem>>, vector<1x4x256xf32>
      %24 = vector.shape_cast %23 : vector<1x4x256xf32> to vector<4x256xf32>
      %25 = vector.shape_cast %21 : vector<4x256xf32> to vector<1x4x256xf32>
      tpu.vector_store %arg16[%22, %c0_11, %c0_12], %25 {strides = array<i32>} : memref<1x4x256xf32, #tpu.memory_space<vmem>>, vector<1x4x256xf32>,
      %c0_13 = arith.constant 0 : index
      %c0_14 = arith.constant 0 : index
      %26 = vector.load %arg17[%c0_13, %c0_14] : memref<1x1xf32, #tpu.memory_space<vmem>>, vector<1x1xf32>
      %27 = vector.shape_cast %21 : vector<4x256xf32> to vector<1x4x256xf32>
      %cst_15 = arith.constant dense<0.000000e+00> : vector<1xf32>
      %28 = vector.multi_reduction <add>, %27, %cst_15 [1, 2] : vector<1x4x256xf32> to vector<1xf32>
      %29 = vector.shape_cast %28 : vector<1xf32> to vector<1x1x1xf32>
      %30 = vector.extract %29[0, 0, 0] : f32 from vector<1x1x1xf32>
      %31 = vector.broadcast %30 : f32 to vector<1x1xf32>
      %32 = arith.addf %26, %31 : vector<1x1xf32>
      %c0_16 = arith.constant 0 : index
      %c0_17 = arith.constant 0 : index
      %33 = vector.load %arg17[%c0_16, %c0_17] : memref<1x1xf32, #tpu.memory_space<vmem>>, vector<1x1xf32>
      tpu.vector_store %arg17[%c0_16, %c0_17], %32 {strides = array<i32>} : memref<1x1xf32, #tpu.memory_space<vmem>>, vector<1x1xf32>,
      %c0_18 = arith.constant 0 : index
      %c0_19 = arith.constant 0 : index
      %34 = vector.load %arg18[%c0_18, %c0_19] : memref<1x1xf32, #tpu.memory_space<vmem>>, vector<1x1xf32>
      %35 = arith.mulf %21, %21 : vector<4x256xf32>
      %36 = vector.shape_cast %35 : vector<4x256xf32> to vector<1x4x256xf32>
      %cst_20 = arith.constant dense<0.000000e+00> : vector<1xf32>
      %37 = vector.multi_reduction <add>, %36, %cst_20 [1, 2] : vector<1x4x256xf32> to vector<1xf32>
      %38 = vector.shape_cast %37 : vector<1xf32> to vector<1x1x1xf32>
      %39 = vector.extract %38[0, 0, 0] : f32 from vector<1x1x1xf32>
      %40 = vector.broadcast %39 : f32 to vector<1x1xf32>
      %41 = arith.addf %34, %40 : vector<1x1xf32>
      %c0_21 = arith.constant 0 : index
      %c0_22 = arith.constant 0 : index
      %42 = vector.load %arg18[%c0_21, %c0_22] : memref<1x1xf32, #tpu.memory_space<vmem>>, vector<1x1xf32>
      tpu.vector_store %arg18[%c0_21, %c0_22], %41 {strides = array<i32>} : memref<1x1xf32, #tpu.memory_space<vmem>>, vector<1x1xf32>,
    } else {
    }
    %c2_i32 = arith.constant 2 : i32
    %11 = arith.cmpi eq, %arg1, %c2_i32 : i32
    %12 = arith.extui %11 : i1 to i32
    %c0_i32_5 = arith.constant 0 : i32
    %13 = arith.cmpi ne, %12, %c0_i32_5 : i32
    scf.if %13 {
      %c0 = arith.constant 0 : index
      %c0_6 = arith.constant 0 : index
      %14 = vector.load %arg17[%c0, %c0_6] : memref<1x1xf32, #tpu.memory_space<vmem>>, vector<1x1xf32>
      %cst = arith.constant 9.765625E-4 : f32
      %15 = vector.broadcast %cst : f32 to vector<1x1xf32>
      %16 = arith.mulf %14, %15 : vector<1x1xf32>
      %c0_7 = arith.constant 0 : index
      %c0_8 = arith.constant 0 : index
      %17 = vector.load %arg18[%c0_7, %c0_8] : memref<1x1xf32, #tpu.memory_space<vmem>>, vector<1x1xf32>
      %cst_9 = arith.constant 9.765625E-4 : f32
      %18 = vector.broadcast %cst_9 : f32 to vector<1x1xf32>
      %19 = arith.mulf %17, %18 : vector<1x1xf32>
      %20 = arith.mulf %16, %16 : vector<1x1xf32>
      %21 = arith.subf %19, %20 : vector<1x1xf32>
      %cst_10 = arith.constant 9.99999974E-6 : f32
      %22 = vector.broadcast %cst_10 : f32 to vector<1x1xf32>
      %23 = arith.addf %21, %22 : vector<1x1xf32>
      %24 = math.rsqrt %23 : vector<1x1xf32>
      %25 = arith.index_cast %arg2 : i32 to index
      %c0_11 = arith.constant 0 : index
      %c0_12 = arith.constant 0 : index
      %26 = vector.load %arg16[%25, %c0_11, %c0_12] : memref<1x4x256xf32, #tpu.memory_space<vmem>>, vector<1x4x256xf32>
      %27 = vector.shape_cast %26 : vector<1x4x256xf32> to vector<4x256xf32>
      %28 = vector.broadcast %16 : vector<1x1xf32> to vector<4x256xf32>
      %29 = arith.subf %27, %28 : vector<4x256xf32>
      %30 = vector.broadcast %24 : vector<1x1xf32> to vector<4x256xf32>
      %31 = arith.mulf %29, %30 : vector<4x256xf32>
      %c0_13 = arith.constant 0 : index
      %c0_14 = arith.constant 0 : index
      %32 = vector.load %arg8[%c0_13, %c0_14] : memref<4x1xf32, #tpu.memory_space<vmem>>, vector<4x1xf32>
      %33 = vector.broadcast %32 : vector<4x1xf32> to vector<4x256xf32>
      %34 = arith.mulf %31, %33 : vector<4x256xf32>
      %c0_15 = arith.constant 0 : index
      %c0_16 = arith.constant 0 : index
      %35 = vector.load %arg9[%c0_15, %c0_16] : memref<4x1xf32, #tpu.memory_space<vmem>>, vector<4x1xf32>
      %36 = vector.broadcast %35 : vector<4x1xf32> to vector<4x256xf32>
      %37 = arith.addf %34, %36 : vector<4x256xf32>
      %c0_17 = arith.constant 0 : index
      %c0_18 = arith.constant 0 : index
      %c0_19 = arith.constant 0 : index
      %38 = vector.load %arg10[%c0_17, %c0_18, %c0_19] : memref<1x4x256xf32, #tpu.memory_space<vmem>>, vector<1x4x256xf32>
      %39 = vector.shape_cast %38 : vector<1x4x256xf32> to vector<4x256xf32>
      %40 = vector.shape_cast %37 : vector<4x256xf32> to vector<1x4x256xf32>
      tpu.vector_store %arg10[%c0_17, %c0_18, %c0_19], %40 {strides = array<i32>} : memref<1x4x256xf32, #tpu.memory_space<vmem>>, vector<1x4x256xf32>,
    } else {
    }
    return
  }
  func.func @transform_0(%arg0: i32, %arg1: i32, %arg2: i32) -> (i32, i32, i32) {
    %c0_i32 = arith.constant 0 : i32
    %0 = arith.cmpi eq, %arg1, %c0_i32 : i32
    %c0_i32_0 = arith.constant 0 : i32
    %1 = arith.select %0, %arg2, %c0_i32_0 : i32
    %c0_i32_1 = arith.constant 0 : i32
    %c0_i32_2 = arith.constant 0 : i32
    return %arg0, %c0_i32_1, %1 : i32, i32, i32
  }
  func.func @transform_1(%arg0: i32, %arg1: i32, %arg2: i32) -> (i32, i32) {
    %c0_i32 = arith.constant 0 : i32
    %c0_i32_0 = arith.constant 0 : i32
    %c0_i32_1 = arith.constant 0 : i32
    return %c0_i32, %c0_i32_0 : i32, i32
  }
  func.func @transform_2(%arg0: i32, %arg1: i32, %arg2: i32) -> (i32, i32) {
    %c0_i32 = arith.constant 0 : i32
    %c0_i32_0 = arith.constant 0 : i32
    %c0_i32_1 = arith.constant 0 : i32
    return %c0_i32, %c0_i32_0 : i32, i32
  }
  func.func @transform_3(%arg0: i32, %arg1: i32, %arg2: i32) -> (i32, i32) {
    %c0_i32 = arith.constant 0 : i32
    %c0_i32_0 = arith.constant 0 : i32
    %c0_i32_1 = arith.constant 0 : i32
    return %c0_i32, %c0_i32_0 : i32, i32
  }
  func.func @transform_4(%arg0: i32, %arg1: i32, %arg2: i32) -> (i32, i32) {
    %c0_i32 = arith.constant 0 : i32
    %c0_i32_0 = arith.constant 0 : i32
    %c0_i32_1 = arith.constant 0 : i32
    return %c0_i32, %c0_i32_0 : i32, i32
  }
  func.func @transform_5(%arg0: i32, %arg1: i32, %arg2: i32) -> (i32, i32) {
    %c0_i32 = arith.constant 0 : i32
    %c0_i32_0 = arith.constant 0 : i32
    %c0_i32_1 = arith.constant 0 : i32
    return %c0_i32, %c0_i32_0 : i32, i32
  }
  func.func @transform_6(%arg0: i32, %arg1: i32, %arg2: i32) -> (i32, i32) {
    %c0_i32 = arith.constant 0 : i32
    %c0_i32_0 = arith.constant 0 : i32
    %c0_i32_1 = arith.constant 0 : i32
    return %c0_i32, %c0_i32_0 : i32, i32
  }
  func.func @transform_7(%arg0: i32, %arg1: i32, %arg2: i32) -> (i32, i32, i32) {
    %c2_i32 = arith.constant 2 : i32
    %0 = arith.cmpi eq, %arg1, %c2_i32 : i32
    %c0_i32 = arith.constant 0 : i32
    %1 = arith.select %0, %arg2, %c0_i32 : i32
    %c0_i32_0 = arith.constant 0 : i32
    %c0_i32_1 = arith.constant 0 : i32
    return %arg0, %c0_i32_0, %1 : i32, i32, i32
  }
}

</mosaic_0001>

<bundles_post_ra>
// kernel: tpu_custom_call.1
= control target key start
LH: loop header
LB: loop body
LE: loop exit
PB: predicated region body
PF: predicated region fallthrough
CT: control target
= control target key end

     0   :  { %s1932_s0 = inlined_call_operand.vmem [shape: f32[2,4,256], index: 0, kind: input, shape index: {}]   ;;  %s1933_s1 = inlined_call_operand.vmem [shape: bf16[96,4], index: 1, kind: input, shape index: {}]   ;;  %s1934_s2 = inlined_call_operand.vmem [shape: bf16[4,32], index: 2, kind: input, shape index: {}]   ;;  %s1935_s3 = inlined_call_operand.vmem [shape: f32[4,1], index: 3, kind: input, shape index: {}]   ;;  %s1936_s4 = inlined_call_operand.vmem [shape: f32[32,32], index: 4, kind: input, shape index: {}]   ;;  %s1937_s5 = inlined_call_operand.vmem [shape: f32[4,1], index: 5, kind: input, shape index: {}]   ;;  %s1938_s6 = inlined_call_operand.vmem [shape: f32[4,1], index: 6, kind: input, shape index: {}]   ;;  %s1939_s7 = inlined_call_operand.hbm [shape: f32[2,4,256], index: 7, kind: output, shape index: {}]  }
   0x1   :  { %1940 = sst [smem:[#allocation13_spill]] %s1932_s0 }
   0x2   :  { %1941 = sst [smem:[#allocation14_spill]] %s1933_s1 }
   0x3   :  { %12 = vsyncpa [#allocation11], 0 }
   0x4   :  { %14 = vsyncpa [#allocation11 + $0x1], 0  ;;  %s1618_s24 = smov 0   ;;  %s1620_s25 = smov 0  }
   0x5   :  { %s1622_s26 = smov 0   ;;  %s1624_s27 = smov 0  }
   0x6   :  { %s1626_s28 = smov 0   ;;  %s1628_s29 = smov 0  }
   0x7   :  { %s1630_s30 = smov 0   ;;  %s1632_s8 = smov 0  }
   0x8 LB: > { %s1266_s9 = sadd.s32 4294967295, %s1567_s8   ;;  %s1267_s10 = sadd.s32 4294967294, %s1567_s8   ;;  %s1567_s8 = sphi %s1632_s8, %s20_s8   ;;  %s1563_s30 = sphi %s1630_s30, %s1952_s30   ;;  %s1559_s29 = sphi %s1628_s29, %s1951_s29   ;;  %s1555_s28 = sphi %s1626_s28, %s1950_s28   ;;  %s1551_s27 = sphi %s1624_s27, %s1949_s27   ;;  %s1547_s26 = sphi %s1622_s26, %s1948_s26   ;;  %s1543_s25 = sphi %s1620_s25, %s1947_s25   ;;  %s1539_s24 = sphi %s1618_s24, %s1946_s24  }
   0x9   : > { %s35_s11 = sadd.s32 1, %s1559_s29  ;;  %s39_s12 = sadd.s32 1, %s1563_s30 }
   0xa   : > { %p37_p0 = scmp.ge.s32.totalorder %s35_s11, 3  ;;  %p220_p1 = scmp.ne.s32.totalorder %s1547_s26, %s1543_s25 }
   0xb   : > { %p221_p2 = scmp.eq.s32.totalorder %s1266_s9, 5  ;;  %p226_p4 = scmp.ne.s32.totalorder %s1543_s25, %s1539_s24 }
   0xc   : > { %s1954_s11 = smov (%p37_p0, %s35_s11), 0  ;;  %s1956_s12 = smov (!%p37_p0, %s39_s12), %s1563_s30 }
   0xd   : > { %p1667_p3 = por %p221_p2, %p220_p1  ;;  %p41_p5 = scmp.ge.s32.totalorder %s1956_s12, 2 }
   0xe   : > { %p227_p6 = scmp.eq.s32.totalorder %s1267_s10, 5  ;;  %p1270_p7 = scmp.ge.s32.totalorder %s1567_s8, 1 }
   0xf   : > { %p280_p8 = scmp.lt.s32.totalorder %s1567_s8, 7  ;;  %s1958_s12 = smov (%p41_p5, %s1956_s12), 0 }
  0x10   : > { %p1677_p9 = por %p227_p6, %p226_p4  ;;  %s205_s15 = ssub.s32 %s1563_s30, %s1958_s12 }
  0x11   : > { %p281_p10 = pnand %p1270_p7, %p280_p8  ;;  %s210_s16 = sadd.s32 1, %s1547_s26 }
  0x12   : > { %p208_p11 = scmp.eq.s32.totalorder %s205_s15, 0  ;;  %s315_s18 = sand.u32 (!%p281_p10), 1, %s1543_s25  }
  0x13   : > { %284 = sbr.rel (%p281_p10) target bundleno = 1724 (0x6bc), region = 48  ;;  %p321_p12 = scmp.lt.s32.totalorder (!%p281_p10), %s1555_s28, 1 }
  0x14   : > { %s1685_s17 = scalar_select %p208_p11, %s1547_s26, %s210_s16  }
  0x15   : > { %s1691_s19 = sshll.u32 (!%p281_p10), %s315_s18, 3  ;;  %p336_p13 = scmp.eq.s32.totalorder (!%p281_p10), %s1551_s27, 0 }
  0x16   : > { %s1944_s0 = sld [smem:[#allocation13_spill]] (!%p281_p10)  ;;  %s317_s10 = scalar_lea.vmem (!%p281_p10), [#allocation10], %s1691_s19 }
  0x1a   : > { %s322_s20 = scalar_select %p321_p12, %s1555_s28, 1 }
  0x1b   : > { %341 = sbr.rel (!%p336_p13) target bundleno = 35 (0x23), region = 52  ;;  %vm342_vm0 = vcmask (%p336_p13), 7168   ;;  %vm351_vm1 = vcmask (%p336_p13), 261120   ;;  %v1569_v0 = vmov (%p336_p13), -inf   ;;  %v1570_v1 = vmov (%p336_p13), 0.0  }
  0x1c   : > { %s1298_s21 = sshll.u32 %s322_s20, 3  ;;  %343 = vst.msk [vmem:[#allocation2] sm:$0xff] (%p336_p13), %vm342_vm0, %v1569_v0  ;;  %344 = vst.msk [vmem:[#allocation2 + $0x8] sm:$0xff] (%p336_p13), %vm342_vm0, %v1569_v0  ;;  %vm356_vm2 = vcmask (%p336_p13), 0  }
  0x1d   : > { %s328_s9 = scalar_lea.vmem %s1944_s0, %s1298_s21  ;;  %345 = vst.msk [vmem:[#allocation2 + $0x10] sm:$0xff] (%p336_p13), %vm342_vm0, %v1569_v0  ;;  %346 = vst.msk [vmem:[#allocation2 + $0x18] sm:$0xff] (%p336_p13), %vm342_vm0, %v1569_v0 }
  0x1e   : > { %347 = vst.msk [vmem:[#allocation3] sm:$0xff] (%p336_p13), %vm342_vm0, %v1570_v1  ;;  %348 = vst.msk [vmem:[#allocation3 + $0x8] sm:$0xff] (%p336_p13), %vm342_vm0, %v1570_v1 }
  0x1f   : > { %349 = vst.msk [vmem:[#allocation3 + $0x10] sm:$0xff] (%p336_p13), %vm342_vm0, %v1570_v1  ;;  %350 = vst.msk [vmem:[#allocation3 + $0x18] sm:$0xff] (%p336_p13), %vm342_vm0, %v1570_v1 }
  0x20   : > { %352 = vst.msk [vmem:[#allocation4] sm:$0xff] (%p336_p13), %vm351_vm1, %v1570_v1  ;;  %353 = vst.msk [vmem:[#allocation4 + $0x8] sm:$0xff] (%p336_p13), %vm351_vm1, %v1570_v1 }
  0x21   : > { %354 = vst.msk [vmem:[#allocation4 + $0x10] sm:$0xff] (%p336_p13), %vm351_vm1, %v1570_v1  ;;  %355 = vst.msk [vmem:[#allocation4 + $0x18] sm:$0xff] (%p336_p13), %vm351_vm1, %v1570_v1 }
  0x22   : > { %357 = vst.msk [vmem:[#allocation8] sm:$0x1] %vm356_vm2, %v1570_v1  ;;  %358 = vst.msk [vmem:[#allocation9] sm:$0x1] %vm356_vm2, %v1570_v1 }
  0x23 PF: > { %p1275_p0 = scmp.ne.s32.totalorder %s1551_s27, 0 }
  0x24   : > { %v362_v2 = vld [vmem:[%s328_s9] sm:$0xff] (!%p1275_p0)  ;;  %vm429_vm3 = vcmask (!%p1275_p0), 1041408   ;;  %v1571_v5 = vmov (!%p1275_p0), 0   ;;  %s1945_s1 = sld [smem:[#allocation14_spill]] (!%p1275_p0)  ;;  %vm410_vm4 = vcmask (!%p1275_p0), 31744   ;;  %vm776_vm5 = vcmask (!%p1275_p0), 7168  }
  0x25   : > { %361 = sbr.rel (%p1275_p0) target bundleno = 1101 (0x44d), region = 56  ;;  %v364_v3 = vcombine.high (!%p1275_p0), %v362_v2, %v362_v2  ;;  %v366_v4 = vpack.c.bf16 (!%p1275_p0), %v362_v2, %v362_v2  ;;  %468 = vmatprep.mubr.bf16.mxu0 (!%p1275_p0), %v1571_v5  ;;  %1395 = vset.pattern.permute.xlu0 (!%p1275_p0), %v1571_v5  ;;  %vm1573_vm6 = vmmov (!%p1275_p0), 0   ;;  %vm870_vm7 = vcmask (!%p1275_p0), 261120  }
  0x26   : > { %1396 = vset.pattern.permute.xlu1 (!%p1275_p0), %v1571_v5  ;;  %vm983_vm8 = vcmask (!%p1275_p0), 254976  }
  0x27   : > { %v367_v6 = vpack.c.bf16 (!%p1275_p0), %v364_v3, %v364_v3  ;;  %v431_v7 = vsel (!%p1275_p0), %vm429_vm3, %v366_v4, 0 }
  0x29   : > { %1282 = vmatprep.subr.msk.bf16.mxu0 (!%p1275_p0), %vm429_vm3, %v367_v6 }
  0x2a   : > { %v1398_v8 = vld [vmem:[%s1945_s1] sm:$0xff] (!%p1275_p0)   ;;  %437 = vmatpush1.bf16.msra.mxu0 (!%p1275_p0), %v431_v7  ;;  %v1399_v9 = vld [vmem:[%s1945_s1 + $0x8] sm:$0xff] (!%p1275_p0)   ;;  %v1400_v10 = vld [vmem:[%s1945_s1 + $0x10] sm:$0xff] (!%p1275_p0)  }
  0x2b   : > { %v1401_v11 = vld [vmem:[%s1945_s1 + $0x18] sm:$0xff] (!%p1275_p0)   ;;  %v1402_v12 = vld [vmem:[%s1945_s1 + $0x20] sm:$0xff] (!%p1275_p0)   ;;  %v1403_v13 = vld [vmem:[%s1945_s1 + $0x28] sm:$0xff] (!%p1275_p0)  }
  0x2d   : > { %1283 = vmatmul.mubr.msk.bf16.vlgmr.msra.gmra.mrb[0].mxu0 %vm410_vm4, %v1398_v8 }
  0x2e   : > { %478 = vmatprep.mubr.bf16.mxu0 %v1571_v5 }
  0x35   : > { %1284 = vmatmul.mubr.msk.bf16.gmra.mrb[4].mxu0 %vm410_vm4, %v1399_v9 }
  0x36   : > { %488 = vmatprep.mubr.bf16.mxu0 %v1571_v5 }
  0x3d   : > { %1285 = vmatmul.mubr.msk.bf16.gmra.mrb[8].mxu0 %vm410_vm4, %v1400_v10 }
  0x3e   : > { %498 = vmatprep.mubr.bf16.mxu0 %v1571_v5 }
  0x45   : > { %1286 = vmatmul.mubr.msk.bf16.gmra.mrb[12].mxu0 %vm410_vm4, %v1401_v11 }
  0x46   : > { %508 = vmatprep.mubr.bf16.mxu0 %v1571_v5 }
  0x4d   : > { %1287 = vmatmul.mubr.msk.bf16.gmra.mrb[16].mxu0 %vm410_vm4, %v1402_v12 }
  0x4e   : > { %518 = vmatprep.mubr.bf16.mxu0 %v1571_v5 }
  0x55   : > { %1288 = vmatmul.mubr.msk.bf16.gmra.mrb[20].mxu0 %vm410_vm4, %v1403_v13 }
 0x100   : > { %v470_v14 = vpop.f32.mrb[0].mxu0 }
 0x101   : > { %v529_v15 = vrot.slane %v470_v14, 4  ;;  %v472_v16 = vpop.f32.mrb[1].mxu0 }
 0x102   : > { %v535_v17 = vrot.slane %v472_v16, 4  ;;  %v474_v18 = vpop.f32.mrb[2].mxu0 }
 0x103   : > { %v530_v19 = vmax.f32 %v470_v14, %v529_v15  ;;  %v541_v20 = vrot.slane %v474_v18, 4  ;;  %v476_v21 = vpop.f32.mrb[3].mxu0 }
 0x104   : > { %v536_v22 = vmax.f32 %v472_v16, %v535_v17  ;;  %v547_v23 = vrot.slane %v476_v21, 4 }
 0x105   : > { %v531_v24 = vrot.slane %v530_v19, 2  ;;  %v542_v25 = vmax.f32 %v474_v18, %v541_v20 }
 0x106   : > { %v537_v26 = vrot.slane %v536_v22, 2  ;;  %v548_v27 = vmax.f32 %v476_v21, %v547_v23 }
 0x107   : > { %v532_v28 = vmax.f32 %v530_v19, %v531_v24  ;;  %v543_v29 = vrot.slane %v542_v25, 2 }
 0x108   : > { %v538_v30 = vmax.f32 %v536_v22, %v537_v26  ;;  %v549_v31 = vrot.slane %v548_v27, 2  ;;  %v480_v32 = vpop.f32.mrb[4].mxu0 }
 0x109   : > { %v533_v33 = vrot.slane %v532_v28, 1  ;;  %v544_v34 = vmax.f32 %v542_v25, %v543_v29  ;;  %v553_v35 = vrot.slane %v480_v32, 4  ;;  %v482_v36 = vpop.f32.mrb[5].mxu0 }
 0x10a   : > { %v539_v37 = vrot.slane %v538_v30, 1  ;;  %v550_v38 = vmax.f32 %v548_v27, %v549_v31  ;;  %v559_v39 = vrot.slane %v482_v36, 4  ;;  %v484_v40 = vpop.f32.mrb[6].mxu0 }
 0x10b   : > { %v534_v41 = vmax.f32 %v532_v28, %v533_v33  ;;  %v545_v42 = vrot.slane %v544_v34, 1  ;;  %v554_v43 = vmax.f32 %v480_v32, %v553_v35  ;;  %v565_v44 = vrot.slane %v484_v40, 4  ;;  %v486_v45 = vpop.f32.mrb[7].mxu0 }
 0x10c   : > { %v540_v46 = vmax.f32 %v538_v30, %v539_v37  ;;  %v551_v47 = vrot.slane %v550_v38, 1  ;;  %v560_v48 = vmax.f32 %v482_v36, %v559_v39  ;;  %v571_v49 = vrot.slane %v486_v45, 4 }
 0x10d   : > { %v577_v50 = vsub.f32 %v470_v14, %v534_v41  ;;  %v546_v51 = vmax.f32 %v544_v34, %v545_v42  ;;  %v555_v52 = vrot.slane %v554_v43, 2  ;;  %v566_v53 = vmax.f32 %v484_v40, %v565_v44 }
 0x10e   : > { %v578_v54 = vsub.f32 %v472_v16, %v540_v46  ;;  %v552_v55 = vmax.f32 %v550_v38, %v551_v47  ;;  %v561_v56 = vrot.slane %v560_v48, 2  ;;  %v572_v57 = vmax.f32 %v486_v45, %v571_v49 }
 0x10f   : > { %v585_v58 = vmul.f32 1.442695, %v577_v50  ;;  %v579_v59 = vsub.f32 %v474_v18, %v546_v51  ;;  %v556_v60 = vmax.f32 %v554_v43, %v555_v52  ;;  %v567_v61 = vrot.slane %v566_v53, 2 }
 0x110   : > { %v587_v62 = vmul.f32 1.442695, %v578_v54  ;;  %v580_v63 = vsub.f32 %v476_v21, %v552_v55  ;;  %v562_v0 = vmax.f32 %v560_v48, %v561_v56  ;;  %v573_v1 = vrot.slane %v572_v57, 2  ;;  %v1724_v2 = vpop.f32.mrb[8].mxu0 }
 0x111   : > { %1404 = vpow2.f32 %v585_v58  ;;  %v589_v3 = vmul.f32 1.442695, %v579_v59  ;;  %v557_v4 = vrot.slane %v556_v60, 1  ;;  %v568_v5 = vmax.f32 %v566_v53, %v567_v61  ;;  %v1726_v6 = vpop.f32.mrb[9].mxu0 }
 0x112   : > { %1406 = vpow2.f32 %v587_v62  ;;  %v591_v7 = vmul.f32 1.442695, %v580_v63  ;;  %v563_v8 = vrot.slane %v562_v0, 1  ;;  %v574_v9 = vmax.f32 %v572_v57, %v573_v1  ;;  %v1728_v10 = vpop.f32.mrb[10].mxu0 }
 0x113   : > { %1408 = vpow2.f32 %v589_v3  ;;  %v558_v11 = vmax.f32 %v556_v60, %v557_v4  ;;  %v569_v12 = vrot.slane %v568_v5, 1  ;;  %v1730_v13 = vpop.f32.mrb[11].mxu0  ;;  %v680_v14 = vmax.f32 %v1724_v2, %v1726_v6 }
 0x114   : > { %1410 = vpow2.f32 %v591_v7  ;;  %v564_v15 = vmax.f32 %v562_v0, %v563_v8  ;;  %v575_v16 = vrot.slane %v574_v9, 1  ;;  %v683_v17 = vmax.f32 %v1728_v10, %v1730_v13 }
 0x115   : > { %v581_v18 = vsub.f32 %v480_v32, %v558_v11  ;;  %v570_v19 = vmax.f32 %v568_v5, %v569_v12  ;;  %681 = vmax.xlane.f32.xlu0 %v680_v14 }
 0x116   : > { %v582_v20 = vsub.f32 %v482_v36, %v564_v15  ;;  %v576_v21 = vmax.f32 %v574_v9, %v575_v16 }
 0x117   : > { %v593_v22 = vmul.f32 1.442695, %v581_v18  ;;  %v583_v23 = vsub.f32 %v484_v40, %v570_v19 }
 0x118   : > { %v595_v24 = vmul.f32 1.442695, %v582_v20  ;;  %v584_v25 = vsub.f32 %v486_v45, %v576_v21  ;;  %v1736_v26 = vpop.f32.mrb[12].mxu0 }
 0x119   : > { %1412 = vpow2.f32 %v593_v22  ;;  %v597_v27 = vmul.f32 1.442695, %v583_v23  ;;  %684 = vmax.xlane.f32.xlu0 %v683_v17  ;;  %v1738_v28 = vpop.f32.mrb[13].mxu0 }
 0x11a   : > { %1414 = vpow2.f32 %v595_v24  ;;  %v599_v29 = vmul.f32 1.442695, %v584_v25  ;;  %v1740_v30 = vpop.f32.mrb[14].mxu0  ;;  %v686_v31 = vmax.f32 %v1736_v26, %v1738_v28 }
 0x11b   : > { %v1744_v32 = vpop.eup %1404  ;;  %1416 = vpow2.f32 %v597_v27  ;;  %v1746_v33 = vpop.f32.mrb[15].mxu0 }
 0x11c   : > { %v1748_v34 = vpop.eup %1406  ;;  %v601_v35 = vrot.slane %v1744_v32, 4  ;;  %1418 = vpow2.f32 %v599_v29  ;;  %687 = vmax.xlane.f32.xlu1 %v686_v31  ;;  %v689_v36 = vmax.f32 %v1740_v30, %v1746_v33 }
 0x11d   : > { %v1753_v37 = vpop.eup %1408  ;;  %v607_v38 = vrot.slane %v1748_v34, 4 }
 0x11e   : > { %v1756_v39 = vpop.eup %1410  ;;  %v602_v40 = vadd.f32 %v1744_v32, %v601_v35  ;;  %v613_v41 = vrot.slane %v1753_v37, 4 }
 0x11f   : > { %v608_v42 = vadd.f32 %v1748_v34, %v607_v38  ;;  %v619_v43 = vrot.slane %v1756_v39, 4 }
 0x120   : > { %v603_v44 = vrot.slane %v602_v40, 2  ;;  %v614_v45 = vadd.f32 %v1753_v37, %v613_v41  ;;  %690 = vmax.xlane.f32.xlu1 %v689_v36 }
 0x121   : > { %v609_v46 = vrot.slane %v608_v42, 2  ;;  %v620_v47 = vadd.f32 %v1756_v39, %v619_v43 }
 0x122   : > { %v604_v48 = vadd.f32 %v603_v44, %v602_v40  ;;  %v615_v49 = vrot.slane %v614_v45, 2 }
 0x123   : > { %v1764_v50 = vpop.eup %1412  ;;  %v610_v51 = vadd.f32 %v609_v46, %v608_v42  ;;  %v621_v52 = vrot.slane %v620_v47, 2 }
 0x124   : > { %v1766_v53 = vpop.eup %1414  ;;  %v605_v54 = vrot.slane %v604_v48, 1  ;;  %v616_v55 = vadd.f32 %v615_v49, %v614_v45  ;;  %v625_v56 = vrot.slane %v1764_v50, 4 }
 0x125   : > { %v1417_v57 = vpop.eup %1416  ;;  %v611_v58 = vrot.slane %v610_v51, 1  ;;  %v622_v59 = vadd.f32 %v621_v52, %v620_v47  ;;  %v631_v60 = vrot.slane %v1766_v53, 4 }
 0x126   : > { %v1419_v61 = vpop.eup %1418  ;;  %v606_v62 = vadd.f32 %v605_v54, %v604_v48  ;;  %v617_v63 = vrot.slane %v616_v55, 1  ;;  %v626_v0 = vadd.f32 %v1764_v50, %v625_v56  ;;  %v637_v1 = vrot.slane %v1417_v57, 4 }
 0x127   : > { %v612_v3 = vadd.f32 %v611_v58, %v610_v51  ;;  %v623_v4 = vrot.slane %v622_v59, 1  ;;  %v632_v5 = vadd.f32 %v1766_v53, %v631_v60  ;;  %v643_v7 = vrot.slane %v1419_v61, 4  ;;  %v1783_v60 = vld [vmem:[#allocation2 + $0x8] sm:$0xff] }
 0x128   : > { %1420 = vrcp.f32 %v606_v62  ;;  %v618_v8 = vadd.f32 %v617_v63, %v616_v55  ;;  %v627_v9 = vrot.slane %v626_v0, 2  ;;  %v638_v11 = vadd.f32 %v1417_v57, %v637_v1  ;;  %v1793_v62 = vld [vmem:[#allocation2 + $0x10] sm:$0xff] }
 0x129   : > { %1422 = vrcp.f32 %v612_v3  ;;  %v624_v12 = vadd.f32 %v623_v4, %v622_v59  ;;  %v633_v14 = vrot.slane %v632_v5, 2  ;;  %v644_v15 = vadd.f32 %v1419_v61, %v643_v7 }
 0x12a   : > { %1424 = vrcp.f32 %v618_v8  ;;  %v628_v16 = vadd.f32 %v627_v9, %v626_v0  ;;  %v639_v17 = vrot.slane %v638_v11, 2  ;;  %v1803_v9 = vld [vmem:[#allocation2 + $0x18] sm:$0xff] }
 0x12b   : > { %1426 = vrcp.f32 %v624_v12  ;;  %v634_v18 = vadd.f32 %v633_v14, %v632_v5  ;;  %v645_v19 = vrot.slane %v644_v15, 2 }
 0x12c   : > { %v629_v20 = vrot.slane %v628_v16, 1  ;;  %v640_v21 = vadd.f32 %v639_v17, %v638_v11 }
 0x12d   : > { %v635_v22 = vrot.slane %v634_v18, 1  ;;  %v646_v23 = vadd.f32 %v645_v19, %v644_v15 }
 0x12e   : > { %v630_v24 = vadd.f32 %v629_v20, %v628_v16  ;;  %v641_v25 = vrot.slane %v640_v21, 1 }
 0x12f   : > { %v636_v27 = vadd.f32 %v635_v22, %v634_v18  ;;  %v647_v29 = vrot.slane %v646_v23, 1 }
 0x130   : > { %1428 = vrcp.f32 %v630_v24  ;;  %v642_v31 = vadd.f32 %v641_v25, %v640_v21 }
 0x131   : > { %1430 = vrcp.f32 %v636_v27  ;;  %v648_v35 = vadd.f32 %v647_v29, %v646_v23 }
 0x132   : > { %v1421_v36 = vpop.eup %1420  ;;  %1432 = vrcp.f32 %v642_v31 }
 0x133   : > { %v1423_v38 = vpop.eup %1422  ;;  %1434 = vrcp.f32 %v648_v35  ;;  %v657_v42 = vmul.f32 %v1421_v36, %v1744_v32 }
 0x134   : > { %v1425_v40 = vpop.eup %1424  ;;  %v658_v44 = vmul.f32 %v1423_v38, %v1748_v34  ;;  %v1778_v34 = vld [vmem:[#allocation2] sm:$0xff] }
 0x135   : > { %v1427_v41 = vpop.eup %1426  ;;  %v659_v43 = vmul.f32 %v1425_v40, %v1753_v37 }
 0x136   : > { %v660_v45 = vmul.f32 %v1427_v41, %v1756_v39 }
 0x137   : > { %v665_v46 = vpack.c.bf16 %v659_v43, %v657_v42 }
 0x138   : > { %v666_v47 = vpack.c.bf16 %v660_v45, %v658_v44 }
 0x139   : > { %672 = vst [vmem:[#allocation6] sm:$0xff] %v665_v46 }
 0x13a   : > { %v1429_v48 = vpop.eup %1428  ;;  %673 = vst [vmem:[#allocation6 + $0x8] sm:$0xff] %v666_v47 }
 0x13b   : > { %v1431_v49 = vpop.eup %1430  ;;  %v661_v54 = vmul.f32 %v1429_v48, %v1764_v50 }
 0x13c   : > { %v1433_v51 = vpop.eup %1432  ;;  %v662_v56 = vmul.f32 %v1431_v49, %v1766_v53 }
 0x13d   : > { %v1435_v52 = vpop.eup %1434  ;;  %v663_v55 = vmul.f32 %v1433_v51, %v1417_v57  ;;  %v510_v57 = vpop.f32.mrb[16].mxu0 }
 0x13e   : > { %v664_v32 = vmul.f32 %v1435_v52, %v1419_v61  ;;  %v512_v63 = vpop.f32.mrb[17].mxu0 }
 0x13f   : > { %v667_v58 = vpack.c.bf16 %v663_v55, %v661_v54  ;;  %v514_v0 = vpop.f32.mrb[18].mxu0 }
 0x140   : > { %v668_v37 = vpack.c.bf16 %v664_v32, %v662_v56  ;;  %v516_v4 = vpop.f32.mrb[19].mxu0  ;;  %v813_v7 = vpack.c.bf16 %v514_v0, %v510_v57 }
 0x141   : > { %674 = vst [vmem:[#allocation6 + $0x10] sm:$0xff] %v667_v58  ;;  %v814_v8 = vpack.c.bf16 %v516_v4, %v512_v63  ;;  %v520_v15 = vpop.f32.mrb[20].mxu0 }
 0x142   : > { %675 = vst [vmem:[#allocation6 + $0x18] sm:$0xff] %v668_v37  ;;  %v522_v16 = vpop.f32.mrb[21].mxu0 }
 0x143   : > { %817 = vmatprep.subr.bf16.mxu1 %v814_v8  ;;  %v524_v18 = vpop.f32.mrb[22].mxu0 }
 0x144   : > { %818 = vmatpush1.bf16.xpose.msra.mxu1 %v813_v7  ;;  %v526_v19 = vpop.f32.mrb[23].mxu0  ;;  %v815_v20 = vpack.c.bf16 %v524_v18, %v520_v15  ;;  %v754_v7 = vld [vmem:[#allocation3 + $0x10] sm:$0xff] }
 0x145   : > { %v816_v21 = vpack.c.bf16 %v526_v19, %v522_v16 }
 0x147   : > { %819 = vmatprep.subr.bf16.mxu1 %v816_v21 }
 0x14c   : > { %820 = vmatpush1.bf16.xpose.msra.mxu1 %v815_v20 }
 0x1a2   : > { %v682_v39 = vpop.xlane.xlu0 %681 }
 0x1a3   : > { %v1781_v59 = vmax.f32 %v1778_v34, %v682_v39 }
 0x1a5   : > { %v696_v50 = vsub.f32 %v1778_v34, %v1781_v59  ;;  %875 = vst.msk [vmem:[#allocation2] sm:$0xff] %vm776_vm5, %v1781_v59  ;;  %710 = vperm.xlu0 %1395, %v1781_v59   ;;  %v752_v59 = vld [vmem:[#allocation3] sm:$0xff] }
 0x1a6   : > { %v685_v53 = vpop.xlane.xlu0 %684 }
 0x1a7   : > { %v1791_v61 = vmax.f32 %v1783_v60, %v685_v53  ;;  %v700_v53 = vmul.f32 1.442695, %v696_v50 }
 0x1a9   : > { %v697_v1 = vsub.f32 %v1783_v60, %v1791_v61  ;;  %876 = vst.msk [vmem:[#allocation2 + $0x8] sm:$0xff] %vm776_vm5, %v1791_v61  ;;  %715 = vperm.xlu1 %1396, %v1791_v61   ;;  %v688_v3 = vpop.xlane.xlu1 %687 }
 0x1aa   : > { %v1801_v5 = vmax.f32 %v1793_v62, %v688_v3  ;;  %v753_v3 = vld [vmem:[#allocation3 + $0x8] sm:$0xff] }
 0x1ab   : > { %v702_v39 = vmul.f32 1.442695, %v697_v1 }
 0x1ac   : > { %v698_v11 = vsub.f32 %v1793_v62, %v1801_v5  ;;  %877 = vst.msk [vmem:[#allocation2 + $0x10] sm:$0xff] %vm776_vm5, %v1801_v5 }
 0x1ad   : > { %720 = vperm.xlu1 %1396, %v1801_v5   ;;  %v691_v12 = vpop.xlane.xlu1 %690 }
 0x1ae   : > { %v1811_v14 = vmax.f32 %v1803_v9, %v691_v12  ;;  %v704_v57 = vmul.f32 1.442695, %v698_v11  ;;  %v755_v12 = vld [vmem:[#allocation3 + $0x18] sm:$0xff] }
 0x1b0   : > { %v699_v17 = vsub.f32 %v1803_v9, %v1811_v14  ;;  %878 = vst.msk [vmem:[#allocation2 + $0x18] sm:$0xff] %vm776_vm5, %v1811_v14 }
 0x1b1   : > { %725 = vperm.xlu1 %1396, %v1811_v14  }
 0x1b2   : > { %v706_v63 = vmul.f32 1.442695, %v699_v17 }
 0x224   : > { %v711_v22 = vpop.permute.xlu0 %710 }
 0x225   : > { %v728_v23 = vsub.f32 %v1724_v2, %v711_v22  ;;  %v729_v24 = vsub.f32 %v1726_v6, %v711_v22 }
 0x227   : > { %v736_v25 = vmul.f32 1.442695, %v728_v23  ;;  %v738_v27 = vmul.f32 1.442695, %v729_v24 }
 0x228   : > { %v716_v29 = vpop.permute.xlu1 %715 }
 0x229   : > { %1436 = vpow2.f32 %v736_v25  ;;  %v730_v31 = vsub.f32 %v1728_v10, %v716_v29  ;;  %v731_v35 = vsub.f32 %v1730_v13, %v716_v29 }
 0x22a   : > { %1438 = vpow2.f32 %v738_v27  ;;  %v1572_v27 = vmov 0.0  }
 0x22b   : > { %v740_v36 = vmul.f32 1.442695, %v730_v31  ;;  %v742_v38 = vmul.f32 1.442695, %v731_v35  ;;  %1304 = vmatprep.subr.bf16.mxu1 %v1572_v27  ;;  %v781_v31 = vld [vmem:[#allocation4] sm:$0xff]  ;;  %v782_v35 = vld [vmem:[#allocation4 + $0x8] sm:$0xff] }
 0x22c   : > { %v721_v40 = vpop.permute.xlu1 %720 }
 0x22d   : > { %1440 = vpow2.f32 %v740_v36  ;;  %v732_v41 = vsub.f32 %v1736_v26, %v721_v40  ;;  %v733_v42 = vsub.f32 %v1738_v28, %v721_v40 }
 0x22e   : > { %1442 = vpow2.f32 %v742_v38 }
 0x22f   : > { %v744_v2 = vmul.f32 1.442695, %v732_v41  ;;  %v746_v6 = vmul.f32 1.442695, %v733_v42 }
 0x230   : > { %v726_v43 = vpop.permute.xlu1 %725 }
 0x231   : > { %1444 = vpow2.f32 %v744_v2  ;;  %v734_v44 = vsub.f32 %v1740_v30, %v726_v43  ;;  %v735_v10 = vsub.f32 %v1746_v33, %v726_v43 }
 0x232   : > { %1446 = vpow2.f32 %v746_v6 }
 0x233   : > { %v1437_v13 = vpop.eup %1436  ;;  %v748_v45 = vmul.f32 1.442695, %v734_v44  ;;  %v750_v46 = vmul.f32 1.442695, %v735_v10 }
 0x234   : > { %v1439_v47 = vpop.eup %1438 }
 0x235   : > { %1448 = vpow2.f32 %v748_v45  ;;  %v760_v48 = vadd.f32 %v1439_v47, %v1437_v13  ;;  %v784_v45 = vld [vmem:[#allocation4 + $0x18] sm:$0xff] }
 0x236   : > { %1450 = vpow2.f32 %v750_v46 }
 0x237   : > { %v1441_v26 = vpop.eup %1440  ;;  %761 = vadd.xlane.f32.xlu1 %v760_v48  ;;  %1452 = vpow2.f32 %v702_v39  ;;  %v922_v39 = vld [vmem:[%s1936_s4] sm:$0xff] }
 0x238   : > { %v1443_v28 = vpop.eup %1442  ;;  %v809_v49 = vpack.c.bf16 %v1441_v26, %v1437_v13  ;;  %1454 = vpow2.f32 %v700_v53  ;;  %v783_v13 = vld [vmem:[#allocation4 + $0x10] sm:$0xff]  ;;  %v923_v53 = vld [vmem:[%s1936_s4 + $0x8] sm:$0xff] }
 0x239   : > { %v810_v51 = vpack.c.bf16 %v1443_v28, %v1439_v47  ;;  %v763_v52 = vadd.f32 %v1443_v28, %v1441_v26  ;;  %1456 = vpow2.f32 %v704_v57 }
 0x23a   : > { %1458 = vpow2.f32 %v706_v63 }
 0x23b   : > { %v1445_v54 = vpop.eup %1444  ;;  %849 = vmatprep.mubr.bf16.mxu1 %v810_v51  ;;  %764 = vadd.xlane.f32.xlu0 %v763_v52 }
 0x23c   : > { %v1447_v30 = vpop.eup %1446  ;;  %850 = vmatmul.mubr.bf16.vlgmr.msra.gmra.mrb[0].mxu1 %v809_v49 }
 0x23d   : > { %v766_v33 = vadd.f32 %v1447_v30, %v1445_v54 }
 0x23f   : > { %v1449_v55 = vpop.eup %1448  ;;  %767 = vadd.xlane.f32.xlu1 %v766_v33 }
 0x240   : > { %v1451_v56 = vpop.eup %1450  ;;  %v811_v32 = vpack.c.bf16 %v1449_v55, %v1445_v54 }
 0x241   : > { %v769_v58 = vadd.f32 %v1451_v56, %v1449_v55  ;;  %v812_v37 = vpack.c.bf16 %v1451_v56, %v1447_v30  ;;  %v1453_v60 = vpop.eup %1452 }
 0x242   : > { %v1455_v61 = vpop.eup %1454  ;;  %v757_v4 = vmul.f32 %v1453_v60, %v753_v3 }
 0x243   : > { %770 = vadd.xlane.f32.xlu1 %v769_v58  ;;  %857 = vmatprep.mubr.bf16.mxu1 %v812_v37  ;;  %v1457_v0 = vpop.eup %1456  ;;  %v756_v50 = vmul.f32 %v1455_v61, %v752_v59 }
 0x244   : > { %858 = vmatmul.mubr.bf16.gmra.mrb[4].mxu1 %v811_v32  ;;  %v1459_v34 = vpop.eup %1458  ;;  %v758_v9 = vmul.f32 %v1457_v0, %v754_v7  ;;  %v925_v7 = vld [vmem:[%s1936_s4 + $0x18] sm:$0xff] }
 0x245   : > { %v759_v16 = vmul.f32 %v1459_v34, %v755_v12  ;;  %1308 = vmatprep.mubr.msk.bf16.mxu1 %vm1573_vm6, %v1572_v27 }
 0x251   : > { %792 = vperm.xlu0 %1395, %v1453_v60  }
 0x254   : > { %787 = vperm.xlu1 %1396, %v1455_v61  }
 0x258   : > { %797 = vperm.xlu1 %1396, %v1457_v0  }
 0x25c   : > { %802 = vperm.xlu1 %1396, %v1459_v34  }
 0x2c4   : > { %v762_v1 = vpop.xlane.xlu1 %761 }
 0x2c5   : > { %v772_v62 = vadd.f32 %v762_v1, %v756_v50 }
 0x2c7   : > { %777 = vst.msk [vmem:[#allocation3] sm:$0xff] %vm776_vm5, %v772_v62 }
 0x2c8   : > { %v765_v5 = vpop.xlane.xlu0 %764 }
 0x2c9   : > { %v773_v8 = vadd.f32 %v765_v5, %v757_v4  ;;  %v924_v5 = vld [vmem:[%s1936_s4 + $0x10] sm:$0xff] }
 0x2cb   : > { %778 = vst.msk [vmem:[#allocation3 + $0x8] sm:$0xff] %vm776_vm5, %v773_v8 }
 0x2cc   : > { %v768_v11 = vpop.xlane.xlu1 %767 }
 0x2cd   : > { %v774_v14 = vadd.f32 %v768_v11, %v758_v9 }
 0x2ce   : > { %v882_v15 = vld [vmem:[#allocation3] sm:$0xff] }
 0x2cf   : > { %779 = vst.msk [vmem:[#allocation3 + $0x10] sm:$0xff] %vm776_vm5, %v774_v14  ;;  %1460 = vrcp.f32 %v882_v15  ;;  %v930_v15 = vld [vmem:[%s1934_s2] sm:$0x3] }
 0x2d0   : > { %v771_v17 = vpop.xlane.xlu1 %770  ;;  %v793_v36 = vpop.permute.xlu0 %792 }
 0x2d1   : > { %v775_v18 = vadd.f32 %v771_v17, %v759_v16  ;;  %v806_v42 = vmul.f32 %v793_v36, %v782_v35 }
 0x2d2   : > { %v883_v19 = vld [vmem:[#allocation3 + $0x8] sm:$0xff] }
 0x2d3   : > { %780 = vst.msk [vmem:[#allocation3 + $0x18] sm:$0xff] %vm776_vm5, %v775_v18  ;;  %1462 = vrcp.f32 %v883_v19 }
 0x2d4   : > { %v788_v29 = vpop.permute.xlu1 %787 }
 0x2d5   : > { %v805_v38 = vmul.f32 %v788_v29, %v781_v31 }
 0x2d6   : > { %v884_v20 = vld [vmem:[#allocation3 + $0x10] sm:$0xff] }
 0x2d7   : > { %1464 = vrcp.f32 %v884_v20 }
 0x2d8   : > { %v798_v40 = vpop.permute.xlu1 %797 }
 0x2d9   : > { %v1461_v21 = vpop.eup %1460  ;;  %v807_v47 = vmul.f32 %v798_v40, %v783_v13 }
 0x2da   : > { %896 = vperm.xlu1 %1396, %v1461_v21   ;;  %v885_v22 = vld [vmem:[#allocation3 + $0x18] sm:$0xff] }
 0x2db   : > { %1466 = vrcp.f32 %v885_v22 }
 0x2dc   : > { %v803_v46 = vpop.permute.xlu1 %802 }
 0x2dd   : > { %v1463_v23 = vpop.eup %1462  ;;  %v808_v26 = vmul.f32 %v803_v46, %v784_v45 }
 0x2de   : > { %901 = vperm.xlu0 %1395, %v1463_v23  }
 0x2e1   : > { %v1465_v24 = vpop.eup %1464 }
 0x2e2   : > { %906 = vperm.xlu1 %1396, %v1465_v24  }
 0x2e5   : > { %v1467_v25 = vpop.eup %1466 }
 0x2e6   : > { %911 = vperm.xlu0 %1395, %v1467_v25  }
 0x30f   : > { %v851_v41 = vpop.f32.mrb[0].mxu1 }
 0x310   : > { %v866_v2 = vadd.f32 %v851_v41, %v805_v38  ;;  %v853_v6 = vpop.f32.mrb[1].mxu1 }
 0x311   : > { %v854_v43 = vpop.f32.mrb[2].mxu1 }
 0x312   : > { %871 = vst.msk [vmem:[#allocation4] sm:$0xff] %vm870_vm7, %v866_v2  ;;  %v867_v44 = vadd.f32 %v854_v43, %v806_v42  ;;  %v856_v10 = vpop.f32.mrb[3].mxu1 }
 0x314   : > { %872 = vst.msk [vmem:[#allocation4 + $0x8] sm:$0xff] %vm870_vm7, %v867_v44 }
 0x317   : > { %v859_v48 = vpop.f32.mrb[4].mxu1 }
 0x318   : > { %v868_v28 = vadd.f32 %v859_v48, %v807_v47  ;;  %v861_v49 = vpop.f32.mrb[5].mxu1 }
 0x319   : > { %v862_v51 = vpop.f32.mrb[6].mxu1  ;;  %v890_v33 = vld [vmem:[#allocation4] sm:$0xff] }
 0x31a   : > { %873 = vst.msk [vmem:[#allocation4 + $0x10] sm:$0xff] %vm870_vm7, %v868_v28  ;;  %v869_v52 = vadd.f32 %v862_v51, %v808_v26  ;;  %v864_v54 = vpop.f32.mrb[7].mxu1 }
 0x31b   : > { %v891_v32 = vld [vmem:[#allocation4 + $0x8] sm:$0xff] }
 0x31c   : > { %874 = vst.msk [vmem:[#allocation4 + $0x18] sm:$0xff] %vm870_vm7, %v869_v52 }
 0x321   : > { %v892_v60 = vld [vmem:[#allocation4 + $0x10] sm:$0xff] }
 0x323   : > { %v893_v1 = vld [vmem:[#allocation4 + $0x18] sm:$0xff] }
 0x359   : > { %v897_v30 = vpop.permute.xlu1 %896 }
 0x35a   : > { %v914_v55 = vmul.f32 %v897_v30, %v890_v33 }
 0x35c   : > { %v918_v58 = vmul.f32 0.35355338, %v914_v55 }
 0x35d   : > { %v902_v56 = vpop.permute.xlu0 %901 }
 0x35e   : > { %v915_v37 = vmul.f32 %v902_v56, %v891_v32  ;;  %v926_v61 = vmul.f32 %v922_v39, %v918_v58 }
 0x360   : > { %v919_v57 = vmul.f32 0.35355338, %v915_v37 }
 0x361   : > { %v907_v63 = vpop.permute.xlu1 %906 }
 0x362   : > { %v927_v0 = vmul.f32 %v923_v53, %v919_v57  ;;  %v916_v34 = vmul.f32 %v907_v63, %v892_v60 }
 0x364   : > { %v931_v59 = vpack.c.bf16 %v927_v0, %v926_v61  ;;  %v920_v3 = vmul.f32 0.35355338, %v916_v34 }
 0x365   : > { %v912_v50 = vpop.permute.xlu0 %911 }
 0x366   : > { %v917_v62 = vmul.f32 %v912_v50, %v893_v1  ;;  %v937_v4 = vsel %vm870_vm7, %v931_v59, 0  ;;  %v928_v9 = vmul.f32 %v924_v5, %v920_v3 }
 0x367   : > { %1305 = vmatpush3.bf16.xpose.msra.mxu1 %v937_v4 }
 0x368   : > { %v921_v8 = vmul.f32 0.35355338, %v917_v62  ;;  %1306 = vmatprep.subr.bf16.mxu1 %v1572_v27 }
 0x36a   : > { %v929_v11 = vmul.f32 %v925_v7, %v921_v8 }
 0x36c   : > { %v932_v12 = vpack.c.bf16 %v929_v11, %v928_v9 }
 0x36e   : > { %v940_v14 = vsel %vm870_vm7, %v932_v12, 0 }
 0x36f   : > { %1307 = vmatpush3.bf16.xpose.msra.mxu1 %v940_v14 }
 0x376   : > { %1309 = vmatmul.mubr.msk.bf16.vlgmr.msra.gmra.mrb[8].mxu1 %vm870_vm7, %v930_v15 }
 0x449   : > { %v976_v16 = vpop.f32.mrb[8].mxu1 }
 0x44a   : > { %v982_v17 = vpack.c.bf16 %v976_v16, %v976_v16  ;;  %v1310_v18 = vpop.f32.mrb[9].mxu1 }
 0x44b   : > { %v979_v19 = vpop.f32.mrb[10].mxu1 }
 0x44c   : > { %984 = vst.msk [vmem:[#allocation5] sm:$0x3] %vm983_vm8, %v982_v17  ;;  %v1311_v20 = vpop.f32.mrb[11].mxu1 }
 0x44d PF: > { %p1290_p1 = scmp.ne.s32.totalorder %s1551_s27, 1 }
 0x44e   : > { %v994_v21 = vld [vmem:[#allocation6 + $0x8] sm:$0xff] (!%p1290_p1)  ;;  %v993_v22 = vld [vmem:[#allocation6] sm:$0xff] (!%p1290_p1)  ;;  %v996_v23 = vld [vmem:[#allocation6 + $0x18] sm:$0xff] (!%p1290_p1)  ;;  %v1574_v24 = vmov (!%p1290_p1), 0   ;;  %vm1003_vm9 = vcmask (!%p1290_p1), 261120   ;;  %vm1057_vm10 = vcmask (!%p1290_p1), 1043456  }
 0x44f   : > { %988 = sbr.rel (%p1290_p1) target bundleno = 1539 (0x603), region = 64  ;;  %1007 = vmatprep.subr.bf16.mxu0 (!%p1290_p1), %v994_v21  ;;  %1039 = vmatprep.mubr.bf16.mxu0 (!%p1290_p1), %v1574_v24  ;;  %v997_v25 = vld [vmem:[%s1935_s3] sm:$0xf] (!%p1290_p1)  ;;  %v995_v27 = vld [vmem:[#allocation6 + $0x10] sm:$0xff] (!%p1290_p1)  ;;  %v1056_v39 = vld [vmem:[#allocation8] sm:$0x1] (!%p1290_p1) }
 0x450   : > { %1008 = vmatpush1.bf16.msra.mxu0 (!%p1290_p1), %v993_v22  ;;  %1468 = vset.pattern.permute.xlu0 (!%p1290_p1), %v1574_v24  ;;  %vm1072_vm11 = vcmask (!%p1290_p1), 0   ;;  %v1074_v57 = vld [vmem:[#allocation9] sm:$0x1] (!%p1290_p1) }
 0x451   : > { %1009 = vmatprep.subr.bf16.mxu0 (!%p1290_p1), %v996_v23  ;;  %1000 = vperm.xlu0 (!%p1290_p1), %1468, %v997_v25  }
 0x453   : > { %v989_v29 = vld [vmem:[#allocation5] sm:$0x3] (!%p1290_p1) }
 0x454   : > { %1010 = vmatpush1.bf16.msra.mxu0 (!%p1290_p1), %v995_v27 }
 0x457   : > { %1291 = vmatmul.mubr.msk.bf16.vlgmr.msra.gmra.mrb[0].mxu0 %vm1003_vm9, %v989_v29 }
 0x4d0   : > { %v1001_v31 = vpop.permute.xlu0 %1000 }
 0x52a   : > { %v1041_v35 = vpop.f32.mrb[0].mxu0 }
 0x52b   : > { %v1042_v36 = vadd.f32 %v1041_v35, %v1001_v31  ;;  %v1043_v38 = vpop.f32.mrb[1].mxu0 }
 0x52c   : > { %v1044_v40 = vadd.f32 %v1043_v38, %v1001_v31  ;;  %v1045_v41 = vpop.f32.mrb[2].mxu0 }
 0x52d   : > { %v1046_v42 = vpop.f32.mrb[3].mxu0  ;;  %v1058_v2 = vsel %vm1057_vm10, %v1042_v36, 0.0  ;;  %v1075_v6 = vmul.f32 %v1042_v36, %v1042_v36 }
 0x52e   : > { %v1050_v43 = vcombine.low %v1042_v36, %v1044_v40  ;;  %v1059_v44 = vsel %vm1057_vm10, %v1044_v40, 0.0  ;;  %v1076_v10 = vmul.f32 %v1044_v40, %v1044_v40 }
 0x52f   : > { %v1060_v13 = vadd.f32 %v1059_v44, %v1058_v2  ;;  %v1077_v45 = vsel %vm1057_vm10, %v1075_v6, 0.0 }
 0x530   : > { %1055 = vst [vmem:[#allocation7] sm:$0xff] %v1050_v43  ;;  %v1078_v46 = vsel %vm1057_vm10, %v1076_v10, 0.0 }
 0x531   : > { %1061 = vadd.xlane.f32.xlu0 %v1060_v13  ;;  %v1079_v47 = vadd.f32 %v1078_v46, %v1077_v45 }
 0x533   : > { %1080 = vadd.xlane.f32.xlu1 %v1079_v47 }
 0x5be   : > { %v1062_v48 = vpop.xlane.xlu0 %1061 }
 0x5bf   : > { %v1063_v26 = vrot.slane %v1062_v48, 4 }
 0x5c0   : > { %v1081_v28 = vpop.xlane.xlu1 %1080 }
 0x5c1   : > { %v1064_v49 = vadd.f32 %v1063_v26, %v1062_v48  ;;  %v1082_v51 = vrot.slane %v1081_v28, 4 }
 0x5c3   : > { %v1065_v52 = vrot.slane %v1064_v49, 2  ;;  %v1083_v54 = vadd.f32 %v1082_v51, %v1081_v28 }
 0x5c5   : > { %v1084_v30 = vrot.slane %v1083_v54, 2  ;;  %v1066_v33 = vadd.f32 %v1065_v52, %v1064_v49 }
 0x5c7   : > { %v1085_v55 = vadd.f32 %v1084_v30, %v1083_v54  ;;  %v1067_v56 = vrot.slane %v1066_v33, 1 }
 0x5c9   : > { %v1068_v32 = vadd.f32 %v1067_v56, %v1066_v33  ;;  %v1086_v58 = vrot.slane %v1085_v55, 1 }
 0x5cb   : > { %1312 = vpush %v1068_v32  ;;  %v1087_v37 = vadd.f32 %v1086_v58, %v1085_v55 }
 0x5cd   : > { %1314 = vpush %v1087_v37 }
 0x5fc   : > { %s1313_s21 = spop %1312 }
 0x5fd   : > { %v1070_v53 = vstv %s1313_s21 }
 0x5fe   : > { %v1071_v63 = vadd.f32 %v1070_v53, %v1056_v39  ;;  %s1315_s22 = spop %1314 }
 0x5ff   : > { %v1089_v60 = vstv %s1315_s22 }
 0x600   : > { %1073 = vst.msk [vmem:[#allocation8] sm:$0x1] %vm1072_vm11, %v1071_v63  ;;  %v1090_v61 = vadd.f32 %v1089_v60, %v1074_v57 }
 0x602   : > { %1091 = vst.msk [vmem:[#allocation9] sm:$0x1] %vm1072_vm11, %v1090_v61 }
 0x603 PF: > { %p1292_p2 = scmp.ne.s32.totalorder %s1551_s27, 2 }
 0x604   : > { %v1128_v0 = vld [vmem:[%s1937_s5] sm:$0xf] (!%p1292_p2)  ;;  %v1109_v59 = vlaneseq (!%p1292_p2)  ;;  %v1575_v50 = vmov (!%p1292_p2), 0   ;;  %v1576_v16 = vmov (!%p1292_p2), 839922192  }
 0x605   : > { %1095 = sbr.rel (%p1292_p2) target bundleno = 1700 (0x6a4), region = 68  ;;  %1470 = vset.pattern.permute.xlu1 (!%p1292_p2), %v1575_v50  ;;  %1469 = vset.pattern.permute.xlu0 (!%p1292_p2), %v1575_v50  ;;  %v1142_v7 = vld [vmem:[%s1938_s6] sm:$0xf] (!%p1292_p2)  ;;  %v1134_v17 = vunpack.c.l.s4 (!%p1292_p2), %v1576_v16 }
 0x606   : > { %1131 = vperm.xlu1 (!%p1292_p2), %1470, %v1128_v0   ;;  %v1110_v4 = vshrl.u32 (!%p1292_p2), %v1109_v59, 7  ;;  %v1107_v21 = vld [vmem:[#allocation7] sm:$0xff] (!%p1292_p2) }
 0x607   : > { %v1096_v34 = vld [vmem:[#allocation8] sm:$0x1] (!%p1292_p2)  ;;  %v1135_v18 = vunpack.c.0.s8 (!%p1292_p2), %v1134_v17 }
 0x608   : > { %v1097_v1 = vmul.f32 (!%p1292_p2), 0.0009765625, %v1096_v34  ;;  %v1111_v8 = vsub.s32 (!%p1292_p2), 0, %v1110_v4 }
 0x609   : > { %v1098_v3 = vld [vmem:[#allocation9] sm:$0x1] (!%p1292_p2)  ;;  %v1138_v22 = vsub.s32 (!%p1292_p2), %v1135_v18, %v1110_v4 }
 0x60a   : > { %v1099_v62 = vmul.f32 (!%p1292_p2), 0.0009765625, %v1098_v3  ;;  %v1100_v5 = vmul.f32 (!%p1292_p2), %v1097_v1, %v1097_v1  ;;  %v1112_v11 = vrot.slane (!%p1292_p2), %v1097_v1, %v1111_v8  ;;  %1145 = vperm.xlu1 (!%p1292_p2), %1470, %v1142_v7  }
 0x60c   : > { %v1101_v9 = vsub.f32 %v1099_v62, %v1100_v5  ;;  %1114 = vperm.xlu0 %1469, %v1112_v11  }
 0x60e   : > { %v1102_v12 = vadd.f32 1e-05, %v1101_v9 }
 0x610   : > { %1471 = vrsqrt.f32 %v1102_v12 }
 0x61a   : > { %v1472_v14 = vpop.eup %1471 }
 0x61b   : > { %v1122_v15 = vrot.slane %v1472_v14, %v1111_v8 }
 0x61d   : > { %1124 = vperm.xlu0 %1469, %v1122_v15  }
 0x685   : > { %v1132_v19 = vpop.permute.xlu1 %1131 }
 0x686   : > { %v1139_v27 = vrot.slane %v1132_v19, %v1138_v22 }
 0x689   : > { %v1146_v24 = vpop.permute.xlu1 %1145 }
 0x68a   : > { %v1153_v31 = vrot.slane %v1146_v24, %v1138_v22 }
 0x68b   : > { %v1115_v20 = vpop.permute.xlu0 %1114 }
 0x68c   : > { %v1117_v23 = vsub.f32 %v1107_v21, %v1115_v20 }
 0x69c   : > { %v1125_v25 = vpop.permute.xlu0 %1124 }
 0x69d   : > { %v1127_v29 = vmul.f32 %v1125_v25, %v1117_v23 }
 0x69f   : > { %v1141_v35 = vmul.f32 %v1139_v27, %v1127_v29 }
 0x6a1   : > { %v1155_v36 = vadd.f32 %v1153_v31, %v1141_v35 }
 0x6a3   : > { %1156 = vst [vmem:[%s317_s10] sm:$0xff] %v1155_v36 }
 0x6a4 PF: > { %s1300_s27 = sshll.u32 %s1555_s28, 7  ;;  %s1176_s23 = sshll.u32 %s317_s10, 4  ;;  %s1177_s23 = int_to_ptr.vmem [resolvable:$true] %s1176_s23 }
 0x6a5   : > { %s1881_s22 = scalar_lea.hbm %s1939_s7, %s1300_s27  ;;  %s1158_s9 = scalar_lea.sflag [#allocation11], %s315_s18 }
 0x6a6   : > { %s1473_s15 = scalar_lea.vmem %s1177_s23, 128  ;;  %s1577_s16 = smov [#allocation10]  }
 0x6a7   : > { %p1474_p4 = scmp.ne.s32.totalorder %s1177_s23, %s1473_s15  ;;  %s1477_s0 = sshll.u32 %s1577_s16, 4  ;;  %s1478_s0 = int_to_ptr.vmem [resolvable:$false] %s1477_s0 }
 0x6a8   : > { %s1479_s1 = scalar_lea.vmem %s1478_s0, 256  ;;  %p1480_p7 = scmp.lt.s32.totalorder %s1177_s23, %s1478_s0 }
 0x6a9   : > { %p1475_p5 = pnand %p1474_p4, %p1667_p3  ;;  %p1481_p8 = scmp.lt.s32.totalorder %s1479_s1, %s1473_s15 }
 0x6ab   : > { %p1476_p6 = pneg %p1475_p5  ;;  %p1482_p10 = por %p1481_p8, %p1480_p7 }
 0x6ad   : > { %p1483_p11 = pnand %p1482_p10, %p1476_p6 }
 0x6af   : > { %1486 = shalt.err (!%p1483_p11)
}
 0x6b0   : > { %s1487_s28 = scalar_lea.hbm %s1881_s22, 128  ;;  %s1491_s10 = scalar_lea.hbm %s1939_s7, 256 }
 0x6b1   : > { %p1488_p12 = scmp.ne.s32.totalorder %s1881_s22, %s1487_s28  ;;  %p1492_p1 = scmp.lt.u32.totalorder %s1881_s22, %s1939_s7 }
 0x6b2   : > { %p1493_p2 = scmp.lt.u32.totalorder %s1491_s10, %s1487_s28  ;;  %p1495_p5 = scmp.lt.u32.totalorder %s1487_s28, %s1881_s22 }
 0x6b3   : > { %p1489_p13 = pnand %p1488_p12, %p1667_p3 }
 0x6b4   : > { %p1494_p4 = por %p1493_p2, %p1492_p1 }
 0x6b5   : > { %p1490_p0 = pneg %p1489_p13 }
 0x6b6   : > { %p1496_p6 = por %p1495_p5, %p1494_p4 }
 0x6b8   : > { %p1497_p7 = pnand %p1496_p6, %p1490_p0 }
 0x6ba   : > { %1500 = shalt.err (!%p1497_p7)
}
 0x6bb   : > { %1316 = dma.vmem_to_hbm [thread:$0]  (%p1667_p3), %s1177_s23, 128, %s1881_s22, %s1158_s9  }
 0x6bc PF: > { %p1322_p8 = scmp.ge.s32.totalorder %s1567_s8, 2  ;;  %s1188_s1 = sand.u32 1, %s1539_s24  }
 0x6bd   : > { %s1189_s20 = scalar_lea.sflag [#allocation11], %s1188_s1 }
 0x6be   : > { %p1319_p10 = pnand %p1322_p8, %p1677_p9 }
 0x6c0   : > { %1534 = dma.done.wait (!%p1319_p10), %s1189_s20, 128  }
 0x6c1   : > { %1536 = vsyncadd (!%p1319_p10), %s1189_s20, 4294967168  ;;  %s20_s8 = sadd.s32 1, %s1567_s8   ;;  %s1946_s24 = smov %s1543_s25 }
 0x6c2   : > { %p17_p11 = scmp.ge.s32.totalorder %s20_s8, 8   ;;  %s1947_s25 = smov %s1547_s26 }
 0x6c3   : > { %s1948_s26 = smov %s1685_s17  ;;  %s1949_s27 = smov %s1559_s29 }
 0x6c4   : > { %s1950_s28 = smov %s1563_s30  ;;  %s1951_s29 = smov %s1954_s11 }
 0x6c5   : > { %s1952_s30 = smov %s1958_s12  ;;  %19 = sbr.rel (!%p17_p11) target bundleno = 8 (0x8), region = 107 }
 0x6cc   :  { %1194 = vsyncpa [#allocation11], 1 }
 0x6cd   :  { %1196 = vsyncpa [#allocation11 + $0x1], 1 }

</bundles_post_ra>
